<compile_context>
chip_gen: v7x
topology: tpu7x:2x2x1
jax: 0.10.0
libtpu: 0.0.40
codegen_flags: <defaults>
</compile_context>

<pallas_src>
import functools

import jax
import jax.numpy as jnp
from jax.experimental import pallas as pl
from jax.experimental.pallas import tpu as pltpu


# ----------------------------------------------------------------------------
# Kernel: encoder layer for a tile of `block_b` batch elements
# ----------------------------------------------------------------------------
def encoder_layer_kernel(
    x_ref,        # (BB, S, D)  f32   input rows for this grid step
    wqkv_t_ref,   # (D, 3D)     bf16  in_proj_weight^T (Q cols pre-scaled)
    bqkv_ref,     # (1, 3D)     f32   (Q entries pre-scaled)
    wo_t_ref,     # (D, D)      bf16  out_proj.weight^T
    bo_ref,       # (1, D)      f32
    w1_t_ref,     # (D, F)      bf16  linear1.weight^T
    b1_ref,       # (1, F)      f32
    w2_t_ref,     # (F, D)      bf16  linear2.weight^T
    b2_ref,       # (1, D)      f32
    g1_ref,       # (1, D)      f32   norm1.weight
    beta1_ref,    # (1, D)      f32   norm1.bias
    g2_ref,       # (1, D)      f32   norm2.weight
    beta2_ref,    # (1, D)      f32   norm2.bias
    o_ref,        # (BB, S, D)
    *,
    nhead: int,
    eps: float,
):
    BB, S, D = x_ref.shape
    H = nhead
    hd = D // H
    R = BB * S

    # fold (BB, S) into R rows so the dense matmuls see a tall M (MXU fill)
    x = x_ref[...].astype(jnp.float32).reshape(R, D)

    # ---- fused QKV projection: ONE (R, D) x (D, 3D) MXU pass ----
    qkv = jnp.dot(x.astype(jnp.bfloat16), wqkv_t_ref[...],
                  preferred_element_type=jnp.float32) + bqkv_ref[...]

    # ---- attention: static loop over heads, B-batched matmuls per head ----
    # (q already carries the 1/sqrt(hd) scale via the folded weights)
    ctx_heads = []
    for h in range(H):
        lo = h * hd
        q_h = qkv[:, lo:lo + hd].reshape(BB, S, hd).astype(jnp.bfloat16)
        k_h = qkv[:, D + lo:D + lo + hd].reshape(BB, S, hd).astype(jnp.bfloat16)
        v_h = qkv[:, 2 * D + lo:2 * D + lo + hd].reshape(BB, S, hd).astype(jnp.bfloat16)

        s = jnp.einsum('bqd,bkd->bqk', q_h, k_h,
                       preferred_element_type=jnp.float32)        # (BB, S, S)
        s = s - jnp.max(s, axis=-1, keepdims=True)
        p = jnp.exp(s)
        p = p * pl.reciprocal(jnp.sum(p, axis=-1, keepdims=True), approx=True)
        ctx_heads.append(
            jnp.einsum('bqk,bkd->bqd', p.astype(jnp.bfloat16), v_h,
                       preferred_element_type=jnp.float32))       # (BB, S, hd)

    # TODO(synk): for long S, replace the materialized (BB,S,S) scores with a
    #             flash-style online-softmax loop over K tiles.
    ctx = jnp.concatenate(ctx_heads, axis=-1).reshape(R, D)

    attn = jnp.dot(ctx.astype(jnp.bfloat16), wo_t_ref[...],
                   preferred_element_type=jnp.float32) + bo_ref[...]

    # TODO(synk): dropout / dropout1 / dropout2 are identity (eval mode);
    #             attn_mask / key_padding_mask not supported (None path only).

    # ---- residual + LayerNorm1 (two-pass variance, PyTorch semantics) ----
    y = x + attn
    mu1 = jnp.mean(y, axis=-1, keepdims=True)
    yc1 = y - mu1
    var1 = jnp.mean(yc1 * yc1, axis=-1, keepdims=True)
    y1 = yc1 * jax.lax.rsqrt(var1 + eps) * g1_ref[...] + beta1_ref[...]

    # ---- feed-forward (ReLU), bf16 operands, f32 accumulation ----
    # TODO(synk): for production F (= 4D) tile this over F-chunks to cap VMEM.
    h1 = jnp.dot(y1.astype(jnp.bfloat16), w1_t_ref[...],
                 preferred_element_type=jnp.float32) + b1_ref[...]
    h1 = jnp.maximum(h1, 0.0)
    ff = jnp.dot(h1.astype(jnp.bfloat16), w2_t_ref[...],
                 preferred_element_type=jnp.float32) + b2_ref[...]

    # ---- residual + LayerNorm2 ----
    y2 = y1 + ff
    mu2 = jnp.mean(y2, axis=-1, keepdims=True)
    yc2 = y2 - mu2
    var2 = jnp.mean(yc2 * yc2, axis=-1, keepdims=True)
    out = yc2 * jax.lax.rsqrt(var2 + eps) * g2_ref[...] + beta2_ref[...]

    o_ref[...] = out.reshape(BB, S, D).astype(o_ref.dtype)


# ----------------------------------------------------------------------------
# Wrapper
# ----------------------------------------------------------------------------
def transformer_encoder_layer(src, params, *, nhead, eps=1e-5, block_b=1,
                              vmem_limit_bytes=32 * 1024 * 1024):
    """src: (S, B, D) float32 -> (S, B, D) float32 (batch_first=False).

    block_b: batch elements per grid step.  In production, size it so that
    R = block_b * S >= 256 (MXU fill) while keeping B // block_b >= 2 on v7x
    so the "parallel" grid axis can be split across both TensorCores.
    """
    S, B, D = src.shape
    assert D % nhead == 0 and B % block_b == 0
    hd = D // nhead
    scale = 1.0 / float(hd) ** 0.5

    # batch-major layout for the kernel (keeps the blocked batch dim out of
    # the tiled last-two dims).  TODO(synk): fold this transpose in-kernel.
    x = jnp.transpose(src, (1, 0, 2))            # (B, S, D)

    # Host-side weight prep: pre-transpose every matmul weight, cast matmul
    # operands to bf16 (f32 accumulation in-kernel), fold the 1/sqrt(hd)
    # attention scale into the Q columns of the fused QKV projection.
    qscale = jnp.concatenate([jnp.full((D,), scale, jnp.float32),
                              jnp.ones((2 * D,), jnp.float32)])
    weights = [
        (params["wqkv"].astype(jnp.float32).T * qscale[None, :]).astype(jnp.bfloat16),
        params["bqkv"].astype(jnp.float32) * qscale[None, :],     # (1, 3D)
        params["wo"].T.astype(jnp.bfloat16),                      # (D, D)
        params["bo"].astype(jnp.float32),                         # (1, D)
        params["w1"].T.astype(jnp.bfloat16),                      # (D, F)
        params["b1"].astype(jnp.float32),                         # (1, F)
        params["w2"].T.astype(jnp.bfloat16),                      # (F, D)
        params["b2"].astype(jnp.float32),                         # (1, D)
        params["g1"].astype(jnp.float32),
        params["beta1"].astype(jnp.float32),
        params["g2"].astype(jnp.float32),
        params["beta2"].astype(jnp.float32),
    ]

    kernel = functools.partial(encoder_layer_kernel, nhead=nhead, eps=eps)
    io_spec = pl.BlockSpec((block_b, S, D), lambda b: (b, 0, 0))

    def run(single_buffer_weights):
        in_specs = [io_spec]
        for w in weights:
            nd = w.ndim
            idx = lambda b, _nd=nd: (0,) * _nd            # grid-invariant block
            if single_buffer_weights:
                # constant weights: one VMEM buffer is enough (default
                # double-buffering would double weight residency at prod sizes)
                spec = pl.BlockSpec(w.shape, idx, pipeline_mode=pl.Buffered(1))
            else:
                spec = pl.BlockSpec(w.shape, idx)
            in_specs.append(spec)
        return pl.pallas_call(
            kernel,
            out_shape=jax.ShapeDtypeStruct((B, S, D), src.dtype),
            grid=(B // block_b,),
            in_specs=in_specs,
            out_specs=io_spec,
            compiler_params=pltpu.CompilerParams(
                dimension_semantics=("parallel",),        # megacore on v7x
                vmem_limit_bytes=vmem_limit_bytes),
        )(x, *weights)

    try:
        out = run(single_buffer_weights=True)
    except Exception:
        # pl.Buffered(1) unsupported on this JAX build -> default buffering.
        out = run(single_buffer_weights=False)
    return jnp.transpose(out, (1, 0, 2))         # back to (S, B, D)


# ----------------------------------------------------------------------------
# Pure-JAX f32 reference (PyTorch semantics) for correctness check
# ----------------------------------------------------------------------------
def reference(src, params, *, nhead, eps=1e-5):
    x = jnp.transpose(src, (1, 0, 2)).astype(jnp.float32)  # (B, S, D)
    D = x.shape[-1]
    hd = D // nhead
    scale = 1.0 / (hd ** 0.5)
    wqkv, bqkv = params["wqkv"], params["bqkv"][0]
    wo, bo = params["wo"], params["bo"][0]
    w1, b1 = params["w1"], params["b1"][0]
    w2, b2 = params["w2"], params["b2"][0]
    g1, be1 = params["g1"][0], params["beta1"][0]
    g2, be2 = params["g2"][0], params["beta2"][0]

    def per_sample(xs):                                     # (S, D)
        q = xs @ wqkv[:D].T + bqkv[:D]
        k = xs @ wqkv[D:2 * D].T + bqkv[D:2 * D]
        v = xs @ wqkv[2 * D:].T + bqkv[2 * D:]
        ctxs = []
        for h in range(nhead):
            sl = slice(h * hd, (h + 1) * hd)
            s = (q[:, sl] * scale) @ k[:, sl].T
            p = jax.nn.softmax(s, axis=-1)
            ctxs.append(p @ v[:, sl])
        ctx = jnp.concatenate(ctxs, axis=-1)
        attn = ctx @ wo.T + bo
        y = xs + attn
        mu = y.mean(-1, keepdims=True)
        var = ((y - mu) ** 2).mean(-1, keepdims=True)
        y1 = (y - mu) * jax.lax.rsqrt(var + eps) * g1 + be1
        ff = jnp.maximum(y1 @ w1.T + b1, 0.0) @ w2.T + b2
        y2 = y1 + ff
        mu2 = y2.mean(-1, keepdims=True)
        var2 = ((y2 - mu2) ** 2).mean(-1, keepdims=True)
        return (y2 - mu2) * jax.lax.rsqrt(var2 + eps) * g2 + be2

    out = jax.vmap(per_sample)(x)
    return jnp.transpose(out, (1, 0, 2))


# ----------------------------------------------------------------------------
# Main
# ----------------------------------------------------------------------------
if __name__ == "__main__":
    S, B, D, NHEAD, FF = 8, 2, 32, 4, 64
    key = jax.random.PRNGKey(0)
    keys = jax.random.split(key, 9)

    params = {
        "wqkv":  jax.random.normal(keys[0], (3 * D, D), jnp.float32) * 0.05,
        "bqkv":  jax.random.normal(keys[1], (1, 3 * D), jnp.float32) * 0.02,
        "wo":    jax.random.normal(keys[2], (D, D), jnp.float32) * 0.05,
        "bo":    jax.random.normal(keys[3], (1, D), jnp.float32) * 0.02,
        "w1":    jax.random.normal(keys[4], (FF, D), jnp.float32) * 0.05,
        "b1":    jax.random.normal(keys[5], (1, FF), jnp.float32) * 0.02,
        "w2":    jax.random.normal(keys[6], (D, FF), jnp.float32) * 0.05,
        "b2":    jax.random.normal(keys[7], (1, D), jnp.float32) * 0.02,
        "g1":    jnp.ones((1, D), jnp.float32),
        "beta1": jnp.zeros((1, D), jnp.float32),
        "g2":    jnp.ones((1, D), jnp.float32),
        "beta2": jnp.zeros((1, D), jnp.float32),
    }

    src = jax.random.normal(keys[8], (S, B, D), jnp.float32)

    ref = reference(src, params, nhead=NHEAD, eps=1e-5)

    # bf16 matmul operands + approx reciprocal vs the f32 reference -> loose tol.
    TOL = 5e-2

    # path 1: one batch element per grid step (grid length 2 -> v7x "parallel"
    # axis is splittable across both TensorCores)
    out1 = jax.block_until_ready(
        transformer_encoder_layer(src, params, nhead=NHEAD, eps=1e-5, block_b=1))
    assert out1.shape == (S, B, D)
    assert jnp.max(jnp.abs(out1 - ref)) < TOL, "mismatch vs reference (block_b=1)"

    # path 2: whole batch folded into one step (max rows per MXU pass here)
    out2 = jax.block_until_ready(
        transformer_encoder_layer(src, params, nhead=NHEAD, eps=1e-5, block_b=2))
    assert jnp.max(jnp.abs(out2 - ref)) < TOL, "mismatch vs reference (block_b=2)"

    print("KERNEL_OK")
</pallas_src>

<mosaic_0001>
module attributes {stable_mosaic.version = 11 : i64} {
  func.func @encoder_layer_kernel(%arg0: i32, %arg1: memref<1x8x32xf32, #tpu.memory_space<vmem>>, %arg2: memref<32x96xbf16, #tpu.memory_space<vmem>>, %arg3: memref<1x96xf32, #tpu.memory_space<vmem>>, %arg4: memref<32x32xbf16, #tpu.memory_space<vmem>>, %arg5: memref<1x32xf32, #tpu.memory_space<vmem>>, %arg6: memref<32x64xbf16, #tpu.memory_space<vmem>>, %arg7: memref<1x64xf32, #tpu.memory_space<vmem>>, %arg8: memref<64x32xbf16, #tpu.memory_space<vmem>>, %arg9: memref<1x32xf32, #tpu.memory_space<vmem>>, %arg10: memref<1x32xf32, #tpu.memory_space<vmem>>, %arg11: memref<1x32xf32, #tpu.memory_space<vmem>>, %arg12: memref<1x32xf32, #tpu.memory_space<vmem>>, %arg13: memref<1x32xf32, #tpu.memory_space<vmem>>, %arg14: memref<1x8x32xf32, #tpu.memory_space<vmem>>) attributes {dimension_semantics = [#tpu.dimension_semantics<parallel>], iteration_bounds = array<i64: 2>, scalar_prefetch = 0 : i64, scratch_operands = 0 : i64, tpu.core_type = #tpu.core_type<tc>, window_params = [{transform_indices = @transform_0, window_bounds = array<i64: 1, 8, 32>}, {pipeline_mode = #tpu.pipeline_mode<synchronous>, transform_indices = @transform_1, window_bounds = array<i64: 32, 96>}, {pipeline_mode = #tpu.pipeline_mode<synchronous>, transform_indices = @transform_2, window_bounds = array<i64: 1, 96>}, {pipeline_mode = #tpu.pipeline_mode<synchronous>, transform_indices = @transform_3, window_bounds = array<i64: 32, 32>}, {pipeline_mode = #tpu.pipeline_mode<synchronous>, transform_indices = @transform_4, window_bounds = array<i64: 1, 32>}, {pipeline_mode = #tpu.pipeline_mode<synchronous>, transform_indices = @transform_5, window_bounds = array<i64: 32, 64>}, {pipeline_mode = #tpu.pipeline_mode<synchronous>, transform_indices = @transform_6, window_bounds = array<i64: 1, 64>}, {pipeline_mode = #tpu.pipeline_mode<synchronous>, transform_indices = @transform_7, window_bounds = array<i64: 64, 32>}, {pipeline_mode = #tpu.pipeline_mode<synchronous>, transform_indices = @transform_8, window_bounds = array<i64: 1, 32>}, {pipeline_mode = #tpu.pipeline_mode<synchronous>, transform_indices = @transform_9, window_bounds = array<i64: 1, 32>}, {pipeline_mode = #tpu.pipeline_mode<synchronous>, transform_indices = @transform_10, window_bounds = array<i64: 1, 32>}, {pipeline_mode = #tpu.pipeline_mode<synchronous>, transform_indices = @transform_11, window_bounds = array<i64: 1, 32>}, {pipeline_mode = #tpu.pipeline_mode<synchronous>, transform_indices = @transform_12, window_bounds = array<i64: 1, 32>}, {transform_indices = @transform_13, window_bounds = array<i64: 1, 8, 32>}]} {
    %c0 = arith.constant 0 : index
    %c0_0 = arith.constant 0 : index
    %c0_1 = arith.constant 0 : index
    %0 = vector.load %arg1[%c0, %c0_0, %c0_1] : memref<1x8x32xf32, #tpu.memory_space<vmem>>, vector<1x8x32xf32>
    %1 = vector.shape_cast %0 : vector<1x8x32xf32> to vector<8x32xf32>
    %2 = arith.truncf %1 : vector<8x32xf32> to vector<8x32xbf16>
    %c0_2 = arith.constant 0 : index
    %c0_3 = arith.constant 0 : index
    %3 = vector.load %arg2[%c0_2, %c0_3] : memref<32x96xbf16, #tpu.memory_space<vmem>>, vector<32x96xbf16>
    %cst = arith.constant dense<0.000000e+00> : vector<8x96xf32>
    %4 = tpu.matmul %2, %3, %cst {dimension_numbers = #tpu.dot_dimension_numbers<[1], [0], [0], [1], [0, 0, 1, 1], [], []>} : vector<8x32xbf16>, vector<32x96xbf16>, vector<8x96xf32> -> vector<8x96xf32>
    %c0_4 = arith.constant 0 : index
    %c0_5 = arith.constant 0 : index
    %5 = vector.load %arg3[%c0_4, %c0_5] : memref<1x96xf32, #tpu.memory_space<vmem>>, vector<1x96xf32>
    %6 = vector.broadcast %5 : vector<1x96xf32> to vector<8x96xf32>
    %7 = arith.addf %4, %6 : vector<8x96xf32>
    %8 = vector.extract_strided_slice %7 {offsets = [0, 0], sizes = [8, 8], strides = [1, 1]} : vector<8x96xf32> to vector<8x8xf32>
    %9 = vector.shape_cast %8 : vector<8x8xf32> to vector<1x8x8xf32>
    %10 = arith.truncf %9 : vector<1x8x8xf32> to vector<1x8x8xbf16>
    %11 = vector.extract_strided_slice %7 {offsets = [0, 32], sizes = [8, 8], strides = [1, 1]} : vector<8x96xf32> to vector<8x8xf32>
    %12 = vector.shape_cast %11 : vector<8x8xf32> to vector<1x8x8xf32>
    %13 = arith.truncf %12 : vector<1x8x8xf32> to vector<1x8x8xbf16>
    %14 = vector.extract_strided_slice %7 {offsets = [0, 64], sizes = [8, 8], strides = [1, 1]} : vector<8x96xf32> to vector<8x8xf32>
    %15 = vector.shape_cast %14 : vector<8x8xf32> to vector<1x8x8xf32>
    %16 = arith.truncf %15 : vector<1x8x8xf32> to vector<1x8x8xbf16>
    "tpu.trace_start"() <{level = 10 : i32, message = "bqd,bkd->bqk"}> : () -> ()
    %cst_6 = arith.constant dense<0.000000e+00> : vector<1x8x8xf32>
    %17 = tpu.matmul %10, %13, %cst_6 {dimension_numbers = #tpu.dot_dimension_numbers<[2], [2], [1], [1], [0, 0, 0, 1, 1, 1], [0], [0]>} : vector<1x8x8xbf16>, vector<1x8x8xbf16>, vector<1x8x8xf32> -> vector<1x8x8xf32>
    "tpu.trace_stop"() : () -> ()
    %cst_7 = arith.constant dense<0xFF800000> : vector<1x8xf32>
    %18 = vector.multi_reduction <maximumf>, %17, %cst_7 [2] : vector<1x8x8xf32> to vector<1x8xf32>
    %19 = vector.shape_cast %18 : vector<1x8xf32> to vector<1x8x1xf32>
    %20 = vector.broadcast %19 : vector<1x8x1xf32> to vector<1x8x8xf32>
    %21 = arith.subf %17, %20 : vector<1x8x8xf32>
    %22 = math.exp %21 : vector<1x8x8xf32>
    %cst_8 = arith.constant dense<0.000000e+00> : vector<1x8xf32>
    %23 = vector.multi_reduction <add>, %22, %cst_8 [2] : vector<1x8x8xf32> to vector<1x8xf32>
    %24 = vector.shape_cast %23 : vector<1x8xf32> to vector<1x8x1xf32>
    %25 = tpu.reciprocal %24 {approx = true} : vector<1x8x1xf32> -> vector<1x8x1xf32>
    %26 = vector.broadcast %25 : vector<1x8x1xf32> to vector<1x8x8xf32>
    %27 = arith.mulf %22, %26 : vector<1x8x8xf32>
    %28 = arith.truncf %27 : vector<1x8x8xf32> to vector<1x8x8xbf16>
    "tpu.trace_start"() <{level = 10 : i32, message = "bqk,bkd->bqd"}> : () -> ()
    %cst_9 = arith.constant dense<0.000000e+00> : vector<1x8x8xf32>
    %29 = tpu.matmul %28, %16, %cst_9 {dimension_numbers = #tpu.dot_dimension_numbers<[2], [1], [1], [2], [0, 0, 0, 1, 1, 2], [0], [0]>} : vector<1x8x8xbf16>, vector<1x8x8xbf16>, vector<1x8x8xf32> -> vector<1x8x8xf32>
    "tpu.trace_stop"() : () -> ()
    %30 = vector.extract_strided_slice %7 {offsets = [0, 8], sizes = [8, 8], strides = [1, 1]} : vector<8x96xf32> to vector<8x8xf32>
    %31 = vector.shape_cast %30 : vector<8x8xf32> to vector<1x8x8xf32>
    %32 = arith.truncf %31 : vector<1x8x8xf32> to vector<1x8x8xbf16>
    %33 = vector.extract_strided_slice %7 {offsets = [0, 40], sizes = [8, 8], strides = [1, 1]} : vector<8x96xf32> to vector<8x8xf32>
    %34 = vector.shape_cast %33 : vector<8x8xf32> to vector<1x8x8xf32>
    %35 = arith.truncf %34 : vector<1x8x8xf32> to vector<1x8x8xbf16>
    %36 = vector.extract_strided_slice %7 {offsets = [0, 72], sizes = [8, 8], strides = [1, 1]} : vector<8x96xf32> to vector<8x8xf32>
    %37 = vector.shape_cast %36 : vector<8x8xf32> to vector<1x8x8xf32>
    %38 = arith.truncf %37 : vector<1x8x8xf32> to vector<1x8x8xbf16>
    "tpu.trace_start"() <{level = 10 : i32, message = "bqd,bkd->bqk"}> : () -> ()
    %cst_10 = arith.constant dense<0.000000e+00> : vector<1x8x8xf32>
    %39 = tpu.matmul %32, %35, %cst_10 {dimension_numbers = #tpu.dot_dimension_numbers<[2], [2], [1], [1], [0, 0, 0, 1, 1, 1], [0], [0]>} : vector<1x8x8xbf16>, vector<1x8x8xbf16>, vector<1x8x8xf32> -> vector<1x8x8xf32>
    "tpu.trace_stop"() : () -> ()
    %cst_11 = arith.constant dense<0xFF800000> : vector<1x8xf32>
    %40 = vector.multi_reduction <maximumf>, %39, %cst_11 [2] : vector<1x8x8xf32> to vector<1x8xf32>
    %41 = vector.shape_cast %40 : vector<1x8xf32> to vector<1x8x1xf32>
    %42 = vector.broadcast %41 : vector<1x8x1xf32> to vector<1x8x8xf32>
    %43 = arith.subf %39, %42 : vector<1x8x8xf32>
    %44 = math.exp %43 : vector<1x8x8xf32>
    %cst_12 = arith.constant dense<0.000000e+00> : vector<1x8xf32>
    %45 = vector.multi_reduction <add>, %44, %cst_12 [2] : vector<1x8x8xf32> to vector<1x8xf32>
    %46 = vector.shape_cast %45 : vector<1x8xf32> to vector<1x8x1xf32>
    %47 = tpu.reciprocal %46 {approx = true} : vector<1x8x1xf32> -> vector<1x8x1xf32>
    %48 = vector.broadcast %47 : vector<1x8x1xf32> to vector<1x8x8xf32>
    %49 = arith.mulf %44, %48 : vector<1x8x8xf32>
    %50 = arith.truncf %49 : vector<1x8x8xf32> to vector<1x8x8xbf16>
    "tpu.trace_start"() <{level = 10 : i32, message = "bqk,bkd->bqd"}> : () -> ()
    %cst_13 = arith.constant dense<0.000000e+00> : vector<1x8x8xf32>
    %51 = tpu.matmul %50, %38, %cst_13 {dimension_numbers = #tpu.dot_dimension_numbers<[2], [1], [1], [2], [0, 0, 0, 1, 1, 2], [0], [0]>} : vector<1x8x8xbf16>, vector<1x8x8xbf16>, vector<1x8x8xf32> -> vector<1x8x8xf32>
    "tpu.trace_stop"() : () -> ()
    %52 = vector.extract_strided_slice %7 {offsets = [0, 16], sizes = [8, 8], strides = [1, 1]} : vector<8x96xf32> to vector<8x8xf32>
    %53 = vector.shape_cast %52 : vector<8x8xf32> to vector<1x8x8xf32>
    %54 = arith.truncf %53 : vector<1x8x8xf32> to vector<1x8x8xbf16>
    %55 = vector.extract_strided_slice %7 {offsets = [0, 48], sizes = [8, 8], strides = [1, 1]} : vector<8x96xf32> to vector<8x8xf32>
    %56 = vector.shape_cast %55 : vector<8x8xf32> to vector<1x8x8xf32>
    %57 = arith.truncf %56 : vector<1x8x8xf32> to vector<1x8x8xbf16>
    %58 = vector.extract_strided_slice %7 {offsets = [0, 80], sizes = [8, 8], strides = [1, 1]} : vector<8x96xf32> to vector<8x8xf32>
    %59 = vector.shape_cast %58 : vector<8x8xf32> to vector<1x8x8xf32>
    %60 = arith.truncf %59 : vector<1x8x8xf32> to vector<1x8x8xbf16>
    "tpu.trace_start"() <{level = 10 : i32, message = "bqd,bkd->bqk"}> : () -> ()
    %cst_14 = arith.constant dense<0.000000e+00> : vector<1x8x8xf32>
    %61 = tpu.matmul %54, %57, %cst_14 {dimension_numbers = #tpu.dot_dimension_numbers<[2], [2], [1], [1], [0, 0, 0, 1, 1, 1], [0], [0]>} : vector<1x8x8xbf16>, vector<1x8x8xbf16>, vector<1x8x8xf32> -> vector<1x8x8xf32>
    "tpu.trace_stop"() : () -> ()
    %cst_15 = arith.constant dense<0xFF800000> : vector<1x8xf32>
    %62 = vector.multi_reduction <maximumf>, %61, %cst_15 [2] : vector<1x8x8xf32> to vector<1x8xf32>
    %63 = vector.shape_cast %62 : vector<1x8xf32> to vector<1x8x1xf32>
    %64 = vector.broadcast %63 : vector<1x8x1xf32> to vector<1x8x8xf32>
    %65 = arith.subf %61, %64 : vector<1x8x8xf32>
    %66 = math.exp %65 : vector<1x8x8xf32>
    %cst_16 = arith.constant dense<0.000000e+00> : vector<1x8xf32>
    %67 = vector.multi_reduction <add>, %66, %cst_16 [2] : vector<1x8x8xf32> to vector<1x8xf32>
    %68 = vector.shape_cast %67 : vector<1x8xf32> to vector<1x8x1xf32>
    %69 = tpu.reciprocal %68 {approx = true} : vector<1x8x1xf32> -> vector<1x8x1xf32>
    %70 = vector.broadcast %69 : vector<1x8x1xf32> to vector<1x8x8xf32>
    %71 = arith.mulf %66, %70 : vector<1x8x8xf32>
    %72 = arith.truncf %71 : vector<1x8x8xf32> to vector<1x8x8xbf16>
    "tpu.trace_start"() <{level = 10 : i32, message = "bqk,bkd->bqd"}> : () -> ()
    %cst_17 = arith.constant dense<0.000000e+00> : vector<1x8x8xf32>
    %73 = tpu.matmul %72, %60, %cst_17 {dimension_numbers = #tpu.dot_dimension_numbers<[2], [1], [1], [2], [0, 0, 0, 1, 1, 2], [0], [0]>} : vector<1x8x8xbf16>, vector<1x8x8xbf16>, vector<1x8x8xf32> -> vector<1x8x8xf32>
    "tpu.trace_stop"() : () -> ()
    %74 = vector.extract_strided_slice %7 {offsets = [0, 24], sizes = [8, 8], strides = [1, 1]} : vector<8x96xf32> to vector<8x8xf32>
    %75 = vector.shape_cast %74 : vector<8x8xf32> to vector<1x8x8xf32>
    %76 = arith.truncf %75 : vector<1x8x8xf32> to vector<1x8x8xbf16>
    %77 = vector.extract_strided_slice %7 {offsets = [0, 56], sizes = [8, 8], strides = [1, 1]} : vector<8x96xf32> to vector<8x8xf32>
    %78 = vector.shape_cast %77 : vector<8x8xf32> to vector<1x8x8xf32>
    %79 = arith.truncf %78 : vector<1x8x8xf32> to vector<1x8x8xbf16>
    %80 = vector.extract_strided_slice %7 {offsets = [0, 88], sizes = [8, 8], strides = [1, 1]} : vector<8x96xf32> to vector<8x8xf32>
    %81 = vector.shape_cast %80 : vector<8x8xf32> to vector<1x8x8xf32>
    %82 = arith.truncf %81 : vector<1x8x8xf32> to vector<1x8x8xbf16>
    "tpu.trace_start"() <{level = 10 : i32, message = "bqd,bkd->bqk"}> : () -> ()
    %cst_18 = arith.constant dense<0.000000e+00> : vector<1x8x8xf32>
    %83 = tpu.matmul %76, %79, %cst_18 {dimension_numbers = #tpu.dot_dimension_numbers<[2], [2], [1], [1], [0, 0, 0, 1, 1, 1], [0], [0]>} : vector<1x8x8xbf16>, vector<1x8x8xbf16>, vector<1x8x8xf32> -> vector<1x8x8xf32>
    "tpu.trace_stop"() : () -> ()
    %cst_19 = arith.constant dense<0xFF800000> : vector<1x8xf32>
    %84 = vector.multi_reduction <maximumf>, %83, %cst_19 [2] : vector<1x8x8xf32> to vector<1x8xf32>
    %85 = vector.shape_cast %84 : vector<1x8xf32> to vector<1x8x1xf32>
    %86 = vector.broadcast %85 : vector<1x8x1xf32> to vector<1x8x8xf32>
    %87 = arith.subf %83, %86 : vector<1x8x8xf32>
    %88 = math.exp %87 : vector<1x8x8xf32>
    %cst_20 = arith.constant dense<0.000000e+00> : vector<1x8xf32>
    %89 = vector.multi_reduction <add>, %88, %cst_20 [2] : vector<1x8x8xf32> to vector<1x8xf32>
    %90 = vector.shape_cast %89 : vector<1x8xf32> to vector<1x8x1xf32>
    %91 = tpu.reciprocal %90 {approx = true} : vector<1x8x1xf32> -> vector<1x8x1xf32>
    %92 = vector.broadcast %91 : vector<1x8x1xf32> to vector<1x8x8xf32>
    %93 = arith.mulf %88, %92 : vector<1x8x8xf32>
    %94 = arith.truncf %93 : vector<1x8x8xf32> to vector<1x8x8xbf16>
    "tpu.trace_start"() <{level = 10 : i32, message = "bqk,bkd->bqd"}> : () -> ()
    %cst_21 = arith.constant dense<0.000000e+00> : vector<1x8x8xf32>
    %95 = tpu.matmul %94, %82, %cst_21 {dimension_numbers = #tpu.dot_dimension_numbers<[2], [1], [1], [2], [0, 0, 0, 1, 1, 2], [0], [0]>} : vector<1x8x8xbf16>, vector<1x8x8xbf16>, vector<1x8x8xf32> -> vector<1x8x8xf32>
    "tpu.trace_stop"() : () -> ()
    %96 = tpu.concatenate %29, %51, %73, %95 in 2 : vector<1x8x8xf32>, vector<1x8x8xf32>, vector<1x8x8xf32>, vector<1x8x8xf32> -> vector<1x8x32xf32>
    %97 = vector.shape_cast %96 : vector<1x8x32xf32> to vector<8x32xf32>
    %98 = arith.truncf %97 : vector<8x32xf32> to vector<8x32xbf16>
    %c0_22 = arith.constant 0 : index
    %c0_23 = arith.constant 0 : index
    %99 = vector.load %arg4[%c0_22, %c0_23] : memref<32x32xbf16, #tpu.memory_space<vmem>>, vector<32x32xbf16>
    %cst_24 = arith.constant dense<0.000000e+00> : vector<8x32xf32>
    %100 = tpu.matmul %98, %99, %cst_24 {dimension_numbers = #tpu.dot_dimension_numbers<[1], [0], [0], [1], [0, 0, 1, 1], [], []>} : vector<8x32xbf16>, vector<32x32xbf16>, vector<8x32xf32> -> vector<8x32xf32>
    %c0_25 = arith.constant 0 : index
    %c0_26 = arith.constant 0 : index
    %101 = vector.load %arg5[%c0_25, %c0_26] : memref<1x32xf32, #tpu.memory_space<vmem>>, vector<1x32xf32>
    %102 = vector.broadcast %101 : vector<1x32xf32> to vector<8x32xf32>
    %103 = arith.addf %100, %102 : vector<8x32xf32>
    %104 = arith.addf %1, %103 : vector<8x32xf32>
    %cst_27 = arith.constant dense<0.000000e+00> : vector<8xf32>
    %105 = vector.multi_reduction <add>, %104, %cst_27 [1] : vector<8x32xf32> to vector<8xf32>
    %106 = vector.shape_cast %105 : vector<8xf32> to vector<8x1xf32>
    %cst_28 = arith.constant 3.200000e+01 : f32
    %107 = vector.broadcast %cst_28 : f32 to vector<8x1xf32>
    %108 = arith.divf %106, %107 : vector<8x1xf32>
    %109 = vector.broadcast %108 : vector<8x1xf32> to vector<8x32xf32>
    %110 = arith.subf %104, %109 : vector<8x32xf32>
    %111 = arith.mulf %110, %110 : vector<8x32xf32>
    %cst_29 = arith.constant dense<0.000000e+00> : vector<8xf32>
    %112 = vector.multi_reduction <add>, %111, %cst_29 [1] : vector<8x32xf32> to vector<8xf32>
    %113 = vector.shape_cast %112 : vector<8xf32> to vector<8x1xf32>
    %cst_30 = arith.constant 3.200000e+01 : f32
    %114 = vector.broadcast %cst_30 : f32 to vector<8x1xf32>
    %115 = arith.divf %113, %114 : vector<8x1xf32>
    %cst_31 = arith.constant 9.99999974E-6 : f32
    %116 = vector.broadcast %cst_31 : f32 to vector<8x1xf32>
    %117 = arith.addf %115, %116 : vector<8x1xf32>
    %118 = math.rsqrt %117 : vector<8x1xf32>
    %119 = vector.broadcast %118 : vector<8x1xf32> to vector<8x32xf32>
    %120 = arith.mulf %110, %119 : vector<8x32xf32>
    %c0_32 = arith.constant 0 : index
    %c0_33 = arith.constant 0 : index
    %121 = vector.load %arg10[%c0_32, %c0_33] : memref<1x32xf32, #tpu.memory_space<vmem>>, vector<1x32xf32>
    %122 = vector.broadcast %121 : vector<1x32xf32> to vector<8x32xf32>
    %123 = arith.mulf %120, %122 : vector<8x32xf32>
    %c0_34 = arith.constant 0 : index
    %c0_35 = arith.constant 0 : index
    %124 = vector.load %arg11[%c0_34, %c0_35] : memref<1x32xf32, #tpu.memory_space<vmem>>, vector<1x32xf32>
    %125 = vector.broadcast %124 : vector<1x32xf32> to vector<8x32xf32>
    %126 = arith.addf %123, %125 : vector<8x32xf32>
    %127 = arith.truncf %126 : vector<8x32xf32> to vector<8x32xbf16>
    %c0_36 = arith.constant 0 : index
    %c0_37 = arith.constant 0 : index
    %128 = vector.load %arg6[%c0_36, %c0_37] : memref<32x64xbf16, #tpu.memory_space<vmem>>, vector<32x64xbf16>
    %cst_38 = arith.constant dense<0.000000e+00> : vector<8x64xf32>
    %129 = tpu.matmul %127, %128, %cst_38 {dimension_numbers = #tpu.dot_dimension_numbers<[1], [0], [0], [1], [0, 0, 1, 1], [], []>} : vector<8x32xbf16>, vector<32x64xbf16>, vector<8x64xf32> -> vector<8x64xf32>
    %c0_39 = arith.constant 0 : index
    %c0_40 = arith.constant 0 : index
    %130 = vector.load %arg7[%c0_39, %c0_40] : memref<1x64xf32, #tpu.memory_space<vmem>>, vector<1x64xf32>
    %131 = vector.broadcast %130 : vector<1x64xf32> to vector<8x64xf32>
    %132 = arith.addf %129, %131 : vector<8x64xf32>
    %cst_41 = arith.constant 0.000000e+00 : f32
    %133 = vector.broadcast %cst_41 : f32 to vector<8x64xf32>
    %134 = arith.maximumf %132, %133 : vector<8x64xf32>
    %135 = arith.truncf %134 : vector<8x64xf32> to vector<8x64xbf16>
    %c0_42 = arith.constant 0 : index
    %c0_43 = arith.constant 0 : index
    %136 = vector.load %arg8[%c0_42, %c0_43] : memref<64x32xbf16, #tpu.memory_space<vmem>>, vector<64x32xbf16>
    %cst_44 = arith.constant dense<0.000000e+00> : vector<8x32xf32>
    %137 = tpu.matmul %135, %136, %cst_44 {dimension_numbers = #tpu.dot_dimension_numbers<[1], [0], [0], [1], [0, 0, 1, 1], [], []>} : vector<8x64xbf16>, vector<64x32xbf16>, vector<8x32xf32> -> vector<8x32xf32>
    %c0_45 = arith.constant 0 : index
    %c0_46 = arith.constant 0 : index
    %138 = vector.load %arg9[%c0_45, %c0_46] : memref<1x32xf32, #tpu.memory_space<vmem>>, vector<1x32xf32>
    %139 = vector.broadcast %138 : vector<1x32xf32> to vector<8x32xf32>
    %140 = arith.addf %137, %139 : vector<8x32xf32>
    %141 = arith.addf %126, %140 : vector<8x32xf32>
    %cst_47 = arith.constant dense<0.000000e+00> : vector<8xf32>
    %142 = vector.multi_reduction <add>, %141, %cst_47 [1] : vector<8x32xf32> to vector<8xf32>
    %143 = vector.shape_cast %142 : vector<8xf32> to vector<8x1xf32>
    %cst_48 = arith.constant 3.200000e+01 : f32
    %144 = vector.broadcast %cst_48 : f32 to vector<8x1xf32>
    %145 = arith.divf %143, %144 : vector<8x1xf32>
    %146 = vector.broadcast %145 : vector<8x1xf32> to vector<8x32xf32>
    %147 = arith.subf %141, %146 : vector<8x32xf32>
    %148 = arith.mulf %147, %147 : vector<8x32xf32>
    %cst_49 = arith.constant dense<0.000000e+00> : vector<8xf32>
    %149 = vector.multi_reduction <add>, %148, %cst_49 [1] : vector<8x32xf32> to vector<8xf32>
    %150 = vector.shape_cast %149 : vector<8xf32> to vector<8x1xf32>
    %cst_50 = arith.constant 3.200000e+01 : f32
    %151 = vector.broadcast %cst_50 : f32 to vector<8x1xf32>
    %152 = arith.divf %150, %151 : vector<8x1xf32>
    %cst_51 = arith.constant 9.99999974E-6 : f32
    %153 = vector.broadcast %cst_51 : f32 to vector<8x1xf32>
    %154 = arith.addf %152, %153 : vector<8x1xf32>
    %155 = math.rsqrt %154 : vector<8x1xf32>
    %156 = vector.broadcast %155 : vector<8x1xf32> to vector<8x32xf32>
    %157 = arith.mulf %147, %156 : vector<8x32xf32>
    %c0_52 = arith.constant 0 : index
    %c0_53 = arith.constant 0 : index
    %158 = vector.load %arg12[%c0_52, %c0_53] : memref<1x32xf32, #tpu.memory_space<vmem>>, vector<1x32xf32>
    %159 = vector.broadcast %158 : vector<1x32xf32> to vector<8x32xf32>
    %160 = arith.mulf %157, %159 : vector<8x32xf32>
    %c0_54 = arith.constant 0 : index
    %c0_55 = arith.constant 0 : index
    %161 = vector.load %arg13[%c0_54, %c0_55] : memref<1x32xf32, #tpu.memory_space<vmem>>, vector<1x32xf32>
    %162 = vector.broadcast %161 : vector<1x32xf32> to vector<8x32xf32>
    %163 = arith.addf %160, %162 : vector<8x32xf32>
    %164 = vector.shape_cast %163 : vector<8x32xf32> to vector<1x8x32xf32>
    %c0_56 = arith.constant 0 : index
    %c0_57 = arith.constant 0 : index
    %c0_58 = arith.constant 0 : index
    %165 = vector.load %arg14[%c0_56, %c0_57, %c0_58] : memref<1x8x32xf32, #tpu.memory_space<vmem>>, vector<1x8x32xf32>
    tpu.vector_store %arg14[%c0_56, %c0_57, %c0_58], %164 {strides = array<i32>} : memref<1x8x32xf32, #tpu.memory_space<vmem>>, vector<1x8x32xf32>,
    return
  }
  func.func @transform_0(%arg0: i32) -> (i32, i32, i32) {
    %c0_i32 = arith.constant 0 : i32
    %c0_i32_0 = arith.constant 0 : i32
    %c0_i32_1 = arith.constant 0 : i32
    return %arg0, %c0_i32, %c0_i32_0 : i32, i32, i32
  }
  func.func @transform_1(%arg0: i32) -> (i32, i32) {
    %c0_i32 = arith.constant 0 : i32
    %c0_i32_0 = arith.constant 0 : i32
    %c0_i32_1 = arith.constant 0 : i32
    return %c0_i32, %c0_i32_0 : i32, i32
  }
  func.func @transform_2(%arg0: i32) -> (i32, i32) {
    %c0_i32 = arith.constant 0 : i32
    %c0_i32_0 = arith.constant 0 : i32
    %c0_i32_1 = arith.constant 0 : i32
    return %c0_i32, %c0_i32_0 : i32, i32
  }
  func.func @transform_3(%arg0: i32) -> (i32, i32) {
    %c0_i32 = arith.constant 0 : i32
    %c0_i32_0 = arith.constant 0 : i32
    %c0_i32_1 = arith.constant 0 : i32
    return %c0_i32, %c0_i32_0 : i32, i32
  }
  func.func @transform_4(%arg0: i32) -> (i32, i32) {
    %c0_i32 = arith.constant 0 : i32
    %c0_i32_0 = arith.constant 0 : i32
    %c0_i32_1 = arith.constant 0 : i32
    return %c0_i32, %c0_i32_0 : i32, i32
  }
  func.func @transform_5(%arg0: i32) -> (i32, i32) {
    %c0_i32 = arith.constant 0 : i32
    %c0_i32_0 = arith.constant 0 : i32
    %c0_i32_1 = arith.constant 0 : i32
    return %c0_i32, %c0_i32_0 : i32, i32
  }
  func.func @transform_6(%arg0: i32) -> (i32, i32) {
    %c0_i32 = arith.constant 0 : i32
    %c0_i32_0 = arith.constant 0 : i32
    %c0_i32_1 = arith.constant 0 : i32
    return %c0_i32, %c0_i32_0 : i32, i32
  }
  func.func @transform_7(%arg0: i32) -> (i32, i32) {
    %c0_i32 = arith.constant 0 : i32
    %c0_i32_0 = arith.constant 0 : i32
    %c0_i32_1 = arith.constant 0 : i32
    return %c0_i32, %c0_i32_0 : i32, i32
  }
  func.func @transform_8(%arg0: i32) -> (i32, i32) {
    %c0_i32 = arith.constant 0 : i32
    %c0_i32_0 = arith.constant 0 : i32
    %c0_i32_1 = arith.constant 0 : i32
    return %c0_i32, %c0_i32_0 : i32, i32
  }
  func.func @transform_9(%arg0: i32) -> (i32, i32) {
    %c0_i32 = arith.constant 0 : i32
    %c0_i32_0 = arith.constant 0 : i32
    %c0_i32_1 = arith.constant 0 : i32
    return %c0_i32, %c0_i32_0 : i32, i32
  }
  func.func @transform_10(%arg0: i32) -> (i32, i32) {
    %c0_i32 = arith.constant 0 : i32
    %c0_i32_0 = arith.constant 0 : i32
    %c0_i32_1 = arith.constant 0 : i32
    return %c0_i32, %c0_i32_0 : i32, i32
  }
  func.func @transform_11(%arg0: i32) -> (i32, i32) {
    %c0_i32 = arith.constant 0 : i32
    %c0_i32_0 = arith.constant 0 : i32
    %c0_i32_1 = arith.constant 0 : i32
    return %c0_i32, %c0_i32_0 : i32, i32
  }
  func.func @transform_12(%arg0: i32) -> (i32, i32) {
    %c0_i32 = arith.constant 0 : i32
    %c0_i32_0 = arith.constant 0 : i32
    %c0_i32_1 = arith.constant 0 : i32
    return %c0_i32, %c0_i32_0 : i32, i32
  }
  func.func @transform_13(%arg0: i32) -> (i32, i32, i32) {
    %c0_i32 = arith.constant 0 : i32
    %c0_i32_0 = arith.constant 0 : i32
    %c0_i32_1 = arith.constant 0 : i32
    return %arg0, %c0_i32, %c0_i32_0 : i32, i32, i32
  }
}

module attributes {stable_mosaic.version = 11 : i64} {
  func.func @encoder_layer_kernel(%arg0: i32, %arg1: memref<1x8x32xf32, #tpu.memory_space<vmem>>, %arg2: memref<32x96xbf16, #tpu.memory_space<vmem>>, %arg3: memref<1x96xf32, #tpu.memory_space<vmem>>, %arg4: memref<32x32xbf16, #tpu.memory_space<vmem>>, %arg5: memref<1x32xf32, #tpu.memory_space<vmem>>, %arg6: memref<32x64xbf16, #tpu.memory_space<vmem>>, %arg7: memref<1x64xf32, #tpu.memory_space<vmem>>, %arg8: memref<64x32xbf16, #tpu.memory_space<vmem>>, %arg9: memref<1x32xf32, #tpu.memory_space<vmem>>, %arg10: memref<1x32xf32, #tpu.memory_space<vmem>>, %arg11: memref<1x32xf32, #tpu.memory_space<vmem>>, %arg12: memref<1x32xf32, #tpu.memory_space<vmem>>, %arg13: memref<1x32xf32, #tpu.memory_space<vmem>>, %arg14: memref<1x8x32xf32, #tpu.memory_space<vmem>>) attributes {dimension_semantics = [#tpu.dimension_semantics<parallel>], iteration_bounds = array<i64: 2>, scalar_prefetch = 0 : i64, scratch_operands = 0 : i64, tpu.core_type = #tpu.core_type<tc>, window_params = [{transform_indices = @transform_0, window_bounds = array<i64: 1, 8, 32>}, {pipeline_mode = #tpu.pipeline_mode<synchronous>, transform_indices = @transform_1, window_bounds = array<i64: 32, 96>}, {pipeline_mode = #tpu.pipeline_mode<synchronous>, transform_indices = @transform_2, window_bounds = array<i64: 1, 96>}, {pipeline_mode = #tpu.pipeline_mode<synchronous>, transform_indices = @transform_3, window_bounds = array<i64: 32, 32>}, {pipeline_mode = #tpu.pipeline_mode<synchronous>, transform_indices = @transform_4, window_bounds = array<i64: 1, 32>}, {pipeline_mode = #tpu.pipeline_mode<synchronous>, transform_indices = @transform_5, window_bounds = array<i64: 32, 64>}, {pipeline_mode = #tpu.pipeline_mode<synchronous>, transform_indices = @transform_6, window_bounds = array<i64: 1, 64>}, {pipeline_mode = #tpu.pipeline_mode<synchronous>, transform_indices = @transform_7, window_bounds = array<i64: 64, 32>}, {pipeline_mode = #tpu.pipeline_mode<synchronous>, transform_indices = @transform_8, window_bounds = array<i64: 1, 32>}, {pipeline_mode = #tpu.pipeline_mode<synchronous>, transform_indices = @transform_9, window_bounds = array<i64: 1, 32>}, {pipeline_mode = #tpu.pipeline_mode<synchronous>, transform_indices = @transform_10, window_bounds = array<i64: 1, 32>}, {pipeline_mode = #tpu.pipeline_mode<synchronous>, transform_indices = @transform_11, window_bounds = array<i64: 1, 32>}, {pipeline_mode = #tpu.pipeline_mode<synchronous>, transform_indices = @transform_12, window_bounds = array<i64: 1, 32>}, {transform_indices = @transform_13, window_bounds = array<i64: 1, 8, 32>}]} {
    %c0 = arith.constant 0 : index
    %c0_0 = arith.constant 0 : index
    %c0_1 = arith.constant 0 : index
    %0 = vector.load %arg1[%c0, %c0_0, %c0_1] : memref<1x8x32xf32, #tpu.memory_space<vmem>>, vector<1x8x32xf32>
    %1 = vector.shape_cast %0 : vector<1x8x32xf32> to vector<8x32xf32>
    %2 = arith.truncf %1 : vector<8x32xf32> to vector<8x32xbf16>
    %c0_2 = arith.constant 0 : index
    %c0_3 = arith.constant 0 : index
    %3 = vector.load %arg2[%c0_2, %c0_3] : memref<32x96xbf16, #tpu.memory_space<vmem>>, vector<32x96xbf16>
    %cst = arith.constant dense<0.000000e+00> : vector<8x96xf32>
    %4 = tpu.matmul %2, %3, %cst {dimension_numbers = #tpu.dot_dimension_numbers<[1], [0], [0], [1], [0, 0, 1, 1], [], []>} : vector<8x32xbf16>, vector<32x96xbf16>, vector<8x96xf32> -> vector<8x96xf32>
    %c0_4 = arith.constant 0 : index
    %c0_5 = arith.constant 0 : index
    %5 = vector.load %arg3[%c0_4, %c0_5] : memref<1x96xf32, #tpu.memory_space<vmem>>, vector<1x96xf32>
    %6 = vector.broadcast %5 : vector<1x96xf32> to vector<8x96xf32>
    %7 = arith.addf %4, %6 : vector<8x96xf32>
    %8 = vector.extract_strided_slice %7 {offsets = [0, 0], sizes = [8, 8], strides = [1, 1]} : vector<8x96xf32> to vector<8x8xf32>
    %9 = vector.shape_cast %8 : vector<8x8xf32> to vector<1x8x8xf32>
    %10 = arith.truncf %9 : vector<1x8x8xf32> to vector<1x8x8xbf16>
    %11 = vector.extract_strided_slice %7 {offsets = [0, 32], sizes = [8, 8], strides = [1, 1]} : vector<8x96xf32> to vector<8x8xf32>
    %12 = vector.shape_cast %11 : vector<8x8xf32> to vector<1x8x8xf32>
    %13 = arith.truncf %12 : vector<1x8x8xf32> to vector<1x8x8xbf16>
    %14 = vector.extract_strided_slice %7 {offsets = [0, 64], sizes = [8, 8], strides = [1, 1]} : vector<8x96xf32> to vector<8x8xf32>
    %15 = vector.shape_cast %14 : vector<8x8xf32> to vector<1x8x8xf32>
    %16 = arith.truncf %15 : vector<1x8x8xf32> to vector<1x8x8xbf16>
    "tpu.trace_start"() <{level = 10 : i32, message = "bqd,bkd->bqk"}> : () -> ()
    %cst_6 = arith.constant dense<0.000000e+00> : vector<1x8x8xf32>
    %17 = tpu.matmul %10, %13, %cst_6 {dimension_numbers = #tpu.dot_dimension_numbers<[2], [2], [1], [1], [0, 0, 0, 1, 1, 1], [0], [0]>} : vector<1x8x8xbf16>, vector<1x8x8xbf16>, vector<1x8x8xf32> -> vector<1x8x8xf32>
    "tpu.trace_stop"() : () -> ()
    %cst_7 = arith.constant dense<0xFF800000> : vector<1x8xf32>
    %18 = vector.multi_reduction <maximumf>, %17, %cst_7 [2] : vector<1x8x8xf32> to vector<1x8xf32>
    %19 = vector.shape_cast %18 : vector<1x8xf32> to vector<1x8x1xf32>
    %20 = vector.broadcast %19 : vector<1x8x1xf32> to vector<1x8x8xf32>
    %21 = arith.subf %17, %20 : vector<1x8x8xf32>
    %22 = math.exp %21 : vector<1x8x8xf32>
    %cst_8 = arith.constant dense<0.000000e+00> : vector<1x8xf32>
    %23 = vector.multi_reduction <add>, %22, %cst_8 [2] : vector<1x8x8xf32> to vector<1x8xf32>
    %24 = vector.shape_cast %23 : vector<1x8xf32> to vector<1x8x1xf32>
    %25 = tpu.reciprocal %24 {approx = true} : vector<1x8x1xf32> -> vector<1x8x1xf32>
    %26 = vector.broadcast %25 : vector<1x8x1xf32> to vector<1x8x8xf32>
    %27 = arith.mulf %22, %26 : vector<1x8x8xf32>
    %28 = arith.truncf %27 : vector<1x8x8xf32> to vector<1x8x8xbf16>
    "tpu.trace_start"() <{level = 10 : i32, message = "bqk,bkd->bqd"}> : () -> ()
    %cst_9 = arith.constant dense<0.000000e+00> : vector<1x8x8xf32>
    %29 = tpu.matmul %28, %16, %cst_9 {dimension_numbers = #tpu.dot_dimension_numbers<[2], [1], [1], [2], [0, 0, 0, 1, 1, 2], [0], [0]>} : vector<1x8x8xbf16>, vector<1x8x8xbf16>, vector<1x8x8xf32> -> vector<1x8x8xf32>
    "tpu.trace_stop"() : () -> ()
    %30 = vector.extract_strided_slice %7 {offsets = [0, 8], sizes = [8, 8], strides = [1, 1]} : vector<8x96xf32> to vector<8x8xf32>
    %31 = vector.shape_cast %30 : vector<8x8xf32> to vector<1x8x8xf32>
    %32 = arith.truncf %31 : vector<1x8x8xf32> to vector<1x8x8xbf16>
    %33 = vector.extract_strided_slice %7 {offsets = [0, 40], sizes = [8, 8], strides = [1, 1]} : vector<8x96xf32> to vector<8x8xf32>
    %34 = vector.shape_cast %33 : vector<8x8xf32> to vector<1x8x8xf32>
    %35 = arith.truncf %34 : vector<1x8x8xf32> to vector<1x8x8xbf16>
    %36 = vector.extract_strided_slice %7 {offsets = [0, 72], sizes = [8, 8], strides = [1, 1]} : vector<8x96xf32> to vector<8x8xf32>
    %37 = vector.shape_cast %36 : vector<8x8xf32> to vector<1x8x8xf32>
    %38 = arith.truncf %37 : vector<1x8x8xf32> to vector<1x8x8xbf16>
    "tpu.trace_start"() <{level = 10 : i32, message = "bqd,bkd->bqk"}> : () -> ()
    %cst_10 = arith.constant dense<0.000000e+00> : vector<1x8x8xf32>
    %39 = tpu.matmul %32, %35, %cst_10 {dimension_numbers = #tpu.dot_dimension_numbers<[2], [2], [1], [1], [0, 0, 0, 1, 1, 1], [0], [0]>} : vector<1x8x8xbf16>, vector<1x8x8xbf16>, vector<1x8x8xf32> -> vector<1x8x8xf32>
    "tpu.trace_stop"() : () -> ()
    %cst_11 = arith.constant dense<0xFF800000> : vector<1x8xf32>
    %40 = vector.multi_reduction <maximumf>, %39, %cst_11 [2] : vector<1x8x8xf32> to vector<1x8xf32>
    %41 = vector.shape_cast %40 : vector<1x8xf32> to vector<1x8x1xf32>
    %42 = vector.broadcast %41 : vector<1x8x1xf32> to vector<1x8x8xf32>
    %43 = arith.subf %39, %42 : vector<1x8x8xf32>
    %44 = math.exp %43 : vector<1x8x8xf32>
    %cst_12 = arith.constant dense<0.000000e+00> : vector<1x8xf32>
    %45 = vector.multi_reduction <add>, %44, %cst_12 [2] : vector<1x8x8xf32> to vector<1x8xf32>
    %46 = vector.shape_cast %45 : vector<1x8xf32> to vector<1x8x1xf32>
    %47 = tpu.reciprocal %46 {approx = true} : vector<1x8x1xf32> -> vector<1x8x1xf32>
    %48 = vector.broadcast %47 : vector<1x8x1xf32> to vector<1x8x8xf32>
    %49 = arith.mulf %44, %48 : vector<1x8x8xf32>
    %50 = arith.truncf %49 : vector<1x8x8xf32> to vector<1x8x8xbf16>
    "tpu.trace_start"() <{level = 10 : i32, message = "bqk,bkd->bqd"}> : () -> ()
    %cst_13 = arith.constant dense<0.000000e+00> : vector<1x8x8xf32>
    %51 = tpu.matmul %50, %38, %cst_13 {dimension_numbers = #tpu.dot_dimension_numbers<[2], [1], [1], [2], [0, 0, 0, 1, 1, 2], [0], [0]>} : vector<1x8x8xbf16>, vector<1x8x8xbf16>, vector<1x8x8xf32> -> vector<1x8x8xf32>
    "tpu.trace_stop"() : () -> ()
    %52 = vector.extract_strided_slice %7 {offsets = [0, 16], sizes = [8, 8], strides = [1, 1]} : vector<8x96xf32> to vector<8x8xf32>
    %53 = vector.shape_cast %52 : vector<8x8xf32> to vector<1x8x8xf32>
    %54 = arith.truncf %53 : vector<1x8x8xf32> to vector<1x8x8xbf16>
    %55 = vector.extract_strided_slice %7 {offsets = [0, 48], sizes = [8, 8], strides = [1, 1]} : vector<8x96xf32> to vector<8x8xf32>
    %56 = vector.shape_cast %55 : vector<8x8xf32> to vector<1x8x8xf32>
    %57 = arith.truncf %56 : vector<1x8x8xf32> to vector<1x8x8xbf16>
    %58 = vector.extract_strided_slice %7 {offsets = [0, 80], sizes = [8, 8], strides = [1, 1]} : vector<8x96xf32> to vector<8x8xf32>
    %59 = vector.shape_cast %58 : vector<8x8xf32> to vector<1x8x8xf32>
    %60 = arith.truncf %59 : vector<1x8x8xf32> to vector<1x8x8xbf16>
    "tpu.trace_start"() <{level = 10 : i32, message = "bqd,bkd->bqk"}> : () -> ()
    %cst_14 = arith.constant dense<0.000000e+00> : vector<1x8x8xf32>
    %61 = tpu.matmul %54, %57, %cst_14 {dimension_numbers = #tpu.dot_dimension_numbers<[2], [2], [1], [1], [0, 0, 0, 1, 1, 1], [0], [0]>} : vector<1x8x8xbf16>, vector<1x8x8xbf16>, vector<1x8x8xf32> -> vector<1x8x8xf32>
    "tpu.trace_stop"() : () -> ()
    %cst_15 = arith.constant dense<0xFF800000> : vector<1x8xf32>
    %62 = vector.multi_reduction <maximumf>, %61, %cst_15 [2] : vector<1x8x8xf32> to vector<1x8xf32>
    %63 = vector.shape_cast %62 : vector<1x8xf32> to vector<1x8x1xf32>
    %64 = vector.broadcast %63 : vector<1x8x1xf32> to vector<1x8x8xf32>
    %65 = arith.subf %61, %64 : vector<1x8x8xf32>
    %66 = math.exp %65 : vector<1x8x8xf32>
    %cst_16 = arith.constant dense<0.000000e+00> : vector<1x8xf32>
    %67 = vector.multi_reduction <add>, %66, %cst_16 [2] : vector<1x8x8xf32> to vector<1x8xf32>
    %68 = vector.shape_cast %67 : vector<1x8xf32> to vector<1x8x1xf32>
    %69 = tpu.reciprocal %68 {approx = true} : vector<1x8x1xf32> -> vector<1x8x1xf32>
    %70 = vector.broadcast %69 : vector<1x8x1xf32> to vector<1x8x8xf32>
    %71 = arith.mulf %66, %70 : vector<1x8x8xf32>
    %72 = arith.truncf %71 : vector<1x8x8xf32> to vector<1x8x8xbf16>
    "tpu.trace_start"() <{level = 10 : i32, message = "bqk,bkd->bqd"}> : () -> ()
    %cst_17 = arith.constant dense<0.000000e+00> : vector<1x8x8xf32>
    %73 = tpu.matmul %72, %60, %cst_17 {dimension_numbers = #tpu.dot_dimension_numbers<[2], [1], [1], [2], [0, 0, 0, 1, 1, 2], [0], [0]>} : vector<1x8x8xbf16>, vector<1x8x8xbf16>, vector<1x8x8xf32> -> vector<1x8x8xf32>
    "tpu.trace_stop"() : () -> ()
    %74 = vector.extract_strided_slice %7 {offsets = [0, 24], sizes = [8, 8], strides = [1, 1]} : vector<8x96xf32> to vector<8x8xf32>
    %75 = vector.shape_cast %74 : vector<8x8xf32> to vector<1x8x8xf32>
    %76 = arith.truncf %75 : vector<1x8x8xf32> to vector<1x8x8xbf16>
    %77 = vector.extract_strided_slice %7 {offsets = [0, 56], sizes = [8, 8], strides = [1, 1]} : vector<8x96xf32> to vector<8x8xf32>
    %78 = vector.shape_cast %77 : vector<8x8xf32> to vector<1x8x8xf32>
    %79 = arith.truncf %78 : vector<1x8x8xf32> to vector<1x8x8xbf16>
    %80 = vector.extract_strided_slice %7 {offsets = [0, 88], sizes = [8, 8], strides = [1, 1]} : vector<8x96xf32> to vector<8x8xf32>
    %81 = vector.shape_cast %80 : vector<8x8xf32> to vector<1x8x8xf32>
    %82 = arith.truncf %81 : vector<1x8x8xf32> to vector<1x8x8xbf16>
    "tpu.trace_start"() <{level = 10 : i32, message = "bqd,bkd->bqk"}> : () -> ()
    %cst_18 = arith.constant dense<0.000000e+00> : vector<1x8x8xf32>
    %83 = tpu.matmul %76, %79, %cst_18 {dimension_numbers = #tpu.dot_dimension_numbers<[2], [2], [1], [1], [0, 0, 0, 1, 1, 1], [0], [0]>} : vector<1x8x8xbf16>, vector<1x8x8xbf16>, vector<1x8x8xf32> -> vector<1x8x8xf32>
    "tpu.trace_stop"() : () -> ()
    %cst_19 = arith.constant dense<0xFF800000> : vector<1x8xf32>
    %84 = vector.multi_reduction <maximumf>, %83, %cst_19 [2] : vector<1x8x8xf32> to vector<1x8xf32>
    %85 = vector.shape_cast %84 : vector<1x8xf32> to vector<1x8x1xf32>
    %86 = vector.broadcast %85 : vector<1x8x1xf32> to vector<1x8x8xf32>
    %87 = arith.subf %83, %86 : vector<1x8x8xf32>
    %88 = math.exp %87 : vector<1x8x8xf32>
    %cst_20 = arith.constant dense<0.000000e+00> : vector<1x8xf32>
    %89 = vector.multi_reduction <add>, %88, %cst_20 [2] : vector<1x8x8xf32> to vector<1x8xf32>
    %90 = vector.shape_cast %89 : vector<1x8xf32> to vector<1x8x1xf32>
    %91 = tpu.reciprocal %90 {approx = true} : vector<1x8x1xf32> -> vector<1x8x1xf32>
    %92 = vector.broadcast %91 : vector<1x8x1xf32> to vector<1x8x8xf32>
    %93 = arith.mulf %88, %92 : vector<1x8x8xf32>
    %94 = arith.truncf %93 : vector<1x8x8xf32> to vector<1x8x8xbf16>
    "tpu.trace_start"() <{level = 10 : i32, message = "bqk,bkd->bqd"}> : () -> ()
    %cst_21 = arith.constant dense<0.000000e+00> : vector<1x8x8xf32>
    %95 = tpu.matmul %94, %82, %cst_21 {dimension_numbers = #tpu.dot_dimension_numbers<[2], [1], [1], [2], [0, 0, 0, 1, 1, 2], [0], [0]>} : vector<1x8x8xbf16>, vector<1x8x8xbf16>, vector<1x8x8xf32> -> vector<1x8x8xf32>
    "tpu.trace_stop"() : () -> ()
    %96 = tpu.concatenate %29, %51, %73, %95 in 2 : vector<1x8x8xf32>, vector<1x8x8xf32>, vector<1x8x8xf32>, vector<1x8x8xf32> -> vector<1x8x32xf32>
    %97 = vector.shape_cast %96 : vector<1x8x32xf32> to vector<8x32xf32>
    %98 = arith.truncf %97 : vector<8x32xf32> to vector<8x32xbf16>
    %c0_22 = arith.constant 0 : index
    %c0_23 = arith.constant 0 : index
    %99 = vector.load %arg4[%c0_22, %c0_23] : memref<32x32xbf16, #tpu.memory_space<vmem>>, vector<32x32xbf16>
    %cst_24 = arith.constant dense<0.000000e+00> : vector<8x32xf32>
    %100 = tpu.matmul %98, %99, %cst_24 {dimension_numbers = #tpu.dot_dimension_numbers<[1], [0], [0], [1], [0, 0, 1, 1], [], []>} : vector<8x32xbf16>, vector<32x32xbf16>, vector<8x32xf32> -> vector<8x32xf32>
    %c0_25 = arith.constant 0 : index
    %c0_26 = arith.constant 0 : index
    %101 = vector.load %arg5[%c0_25, %c0_26] : memref<1x32xf32, #tpu.memory_space<vmem>>, vector<1x32xf32>
    %102 = vector.broadcast %101 : vector<1x32xf32> to vector<8x32xf32>
    %103 = arith.addf %100, %102 : vector<8x32xf32>
    %104 = arith.addf %1, %103 : vector<8x32xf32>
    %cst_27 = arith.constant dense<0.000000e+00> : vector<8xf32>
    %105 = vector.multi_reduction <add>, %104, %cst_27 [1] : vector<8x32xf32> to vector<8xf32>
    %106 = vector.shape_cast %105 : vector<8xf32> to vector<8x1xf32>
    %cst_28 = arith.constant 3.200000e+01 : f32
    %107 = vector.broadcast %cst_28 : f32 to vector<8x1xf32>
    %108 = arith.divf %106, %107 : vector<8x1xf32>
    %109 = vector.broadcast %108 : vector<8x1xf32> to vector<8x32xf32>
    %110 = arith.subf %104, %109 : vector<8x32xf32>
    %111 = arith.mulf %110, %110 : vector<8x32xf32>
    %cst_29 = arith.constant dense<0.000000e+00> : vector<8xf32>
    %112 = vector.multi_reduction <add>, %111, %cst_29 [1] : vector<8x32xf32> to vector<8xf32>
    %113 = vector.shape_cast %112 : vector<8xf32> to vector<8x1xf32>
    %cst_30 = arith.constant 3.200000e+01 : f32
    %114 = vector.broadcast %cst_30 : f32 to vector<8x1xf32>
    %115 = arith.divf %113, %114 : vector<8x1xf32>
    %cst_31 = arith.constant 9.99999974E-6 : f32
    %116 = vector.broadcast %cst_31 : f32 to vector<8x1xf32>
    %117 = arith.addf %115, %116 : vector<8x1xf32>
    %118 = math.rsqrt %117 : vector<8x1xf32>
    %119 = vector.broadcast %118 : vector<8x1xf32> to vector<8x32xf32>
    %120 = arith.mulf %110, %119 : vector<8x32xf32>
    %c0_32 = arith.constant 0 : index
    %c0_33 = arith.constant 0 : index
    %121 = vector.load %arg10[%c0_32, %c0_33] : memref<1x32xf32, #tpu.memory_space<vmem>>, vector<1x32xf32>
    %122 = vector.broadcast %121 : vector<1x32xf32> to vector<8x32xf32>
    %123 = arith.mulf %120, %122 : vector<8x32xf32>
    %c0_34 = arith.constant 0 : index
    %c0_35 = arith.constant 0 : index
    %124 = vector.load %arg11[%c0_34, %c0_35] : memref<1x32xf32, #tpu.memory_space<vmem>>, vector<1x32xf32>
    %125 = vector.broadcast %124 : vector<1x32xf32> to vector<8x32xf32>
    %126 = arith.addf %123, %125 : vector<8x32xf32>
    %127 = arith.truncf %126 : vector<8x32xf32> to vector<8x32xbf16>
    %c0_36 = arith.constant 0 : index
    %c0_37 = arith.constant 0 : index
    %128 = vector.load %arg6[%c0_36, %c0_37] : memref<32x64xbf16, #tpu.memory_space<vmem>>, vector<32x64xbf16>
    %cst_38 = arith.constant dense<0.000000e+00> : vector<8x64xf32>
    %129 = tpu.matmul %127, %128, %cst_38 {dimension_numbers = #tpu.dot_dimension_numbers<[1], [0], [0], [1], [0, 0, 1, 1], [], []>} : vector<8x32xbf16>, vector<32x64xbf16>, vector<8x64xf32> -> vector<8x64xf32>
    %c0_39 = arith.constant 0 : index
    %c0_40 = arith.constant 0 : index
    %130 = vector.load %arg7[%c0_39, %c0_40] : memref<1x64xf32, #tpu.memory_space<vmem>>, vector<1x64xf32>
    %131 = vector.broadcast %130 : vector<1x64xf32> to vector<8x64xf32>
    %132 = arith.addf %129, %131 : vector<8x64xf32>
    %cst_41 = arith.constant 0.000000e+00 : f32
    %133 = vector.broadcast %cst_41 : f32 to vector<8x64xf32>
    %134 = arith.maximumf %132, %133 : vector<8x64xf32>
    %135 = arith.truncf %134 : vector<8x64xf32> to vector<8x64xbf16>
    %c0_42 = arith.constant 0 : index
    %c0_43 = arith.constant 0 : index
    %136 = vector.load %arg8[%c0_42, %c0_43] : memref<64x32xbf16, #tpu.memory_space<vmem>>, vector<64x32xbf16>
    %cst_44 = arith.constant dense<0.000000e+00> : vector<8x32xf32>
    %137 = tpu.matmul %135, %136, %cst_44 {dimension_numbers = #tpu.dot_dimension_numbers<[1], [0], [0], [1], [0, 0, 1, 1], [], []>} : vector<8x64xbf16>, vector<64x32xbf16>, vector<8x32xf32> -> vector<8x32xf32>
    %c0_45 = arith.constant 0 : index
    %c0_46 = arith.constant 0 : index
    %138 = vector.load %arg9[%c0_45, %c0_46] : memref<1x32xf32, #tpu.memory_space<vmem>>, vector<1x32xf32>
    %139 = vector.broadcast %138 : vector<1x32xf32> to vector<8x32xf32>
    %140 = arith.addf %137, %139 : vector<8x32xf32>
    %141 = arith.addf %126, %140 : vector<8x32xf32>
    %cst_47 = arith.constant dense<0.000000e+00> : vector<8xf32>
    %142 = vector.multi_reduction <add>, %141, %cst_47 [1] : vector<8x32xf32> to vector<8xf32>
    %143 = vector.shape_cast %142 : vector<8xf32> to vector<8x1xf32>
    %cst_48 = arith.constant 3.200000e+01 : f32
    %144 = vector.broadcast %cst_48 : f32 to vector<8x1xf32>
    %145 = arith.divf %143, %144 : vector<8x1xf32>
    %146 = vector.broadcast %145 : vector<8x1xf32> to vector<8x32xf32>
    %147 = arith.subf %141, %146 : vector<8x32xf32>
    %148 = arith.mulf %147, %147 : vector<8x32xf32>
    %cst_49 = arith.constant dense<0.000000e+00> : vector<8xf32>
    %149 = vector.multi_reduction <add>, %148, %cst_49 [1] : vector<8x32xf32> to vector<8xf32>
    %150 = vector.shape_cast %149 : vector<8xf32> to vector<8x1xf32>
    %cst_50 = arith.constant 3.200000e+01 : f32
    %151 = vector.broadcast %cst_50 : f32 to vector<8x1xf32>
    %152 = arith.divf %150, %151 : vector<8x1xf32>
    %cst_51 = arith.constant 9.99999974E-6 : f32
    %153 = vector.broadcast %cst_51 : f32 to vector<8x1xf32>
    %154 = arith.addf %152, %153 : vector<8x1xf32>
    %155 = math.rsqrt %154 : vector<8x1xf32>
    %156 = vector.broadcast %155 : vector<8x1xf32> to vector<8x32xf32>
    %157 = arith.mulf %147, %156 : vector<8x32xf32>
    %c0_52 = arith.constant 0 : index
    %c0_53 = arith.constant 0 : index
    %158 = vector.load %arg12[%c0_52, %c0_53] : memref<1x32xf32, #tpu.memory_space<vmem>>, vector<1x32xf32>
    %159 = vector.broadcast %158 : vector<1x32xf32> to vector<8x32xf32>
    %160 = arith.mulf %157, %159 : vector<8x32xf32>
    %c0_54 = arith.constant 0 : index
    %c0_55 = arith.constant 0 : index
    %161 = vector.load %arg13[%c0_54, %c0_55] : memref<1x32xf32, #tpu.memory_space<vmem>>, vector<1x32xf32>
    %162 = vector.broadcast %161 : vector<1x32xf32> to vector<8x32xf32>
    %163 = arith.addf %160, %162 : vector<8x32xf32>
    %164 = vector.shape_cast %163 : vector<8x32xf32> to vector<1x8x32xf32>
    %c0_56 = arith.constant 0 : index
    %c0_57 = arith.constant 0 : index
    %c0_58 = arith.constant 0 : index
    %165 = vector.load %arg14[%c0_56, %c0_57, %c0_58] : memref<1x8x32xf32, #tpu.memory_space<vmem>>, vector<1x8x32xf32>
    tpu.vector_store %arg14[%c0_56, %c0_57, %c0_58], %164 {strides = array<i32>} : memref<1x8x32xf32, #tpu.memory_space<vmem>>, vector<1x8x32xf32>,
    return
  }
  func.func @transform_0(%arg0: i32) -> (i32, i32, i32) {
    %c0_i32 = arith.constant 0 : i32
    %c0_i32_0 = arith.constant 0 : i32
    %c0_i32_1 = arith.constant 0 : i32
    return %arg0, %c0_i32, %c0_i32_0 : i32, i32, i32
  }
  func.func @transform_1(%arg0: i32) -> (i32, i32) {
    %c0_i32 = arith.constant 0 : i32
    %c0_i32_0 = arith.constant 0 : i32
    %c0_i32_1 = arith.constant 0 : i32
    return %c0_i32, %c0_i32_0 : i32, i32
  }
  func.func @transform_2(%arg0: i32) -> (i32, i32) {
    %c0_i32 = arith.constant 0 : i32
    %c0_i32_0 = arith.constant 0 : i32
    %c0_i32_1 = arith.constant 0 : i32
    return %c0_i32, %c0_i32_0 : i32, i32
  }
  func.func @transform_3(%arg0: i32) -> (i32, i32) {
    %c0_i32 = arith.constant 0 : i32
    %c0_i32_0 = arith.constant 0 : i32
    %c0_i32_1 = arith.constant 0 : i32
    return %c0_i32, %c0_i32_0 : i32, i32
  }
  func.func @transform_4(%arg0: i32) -> (i32, i32) {
    %c0_i32 = arith.constant 0 : i32
    %c0_i32_0 = arith.constant 0 : i32
    %c0_i32_1 = arith.constant 0 : i32
    return %c0_i32, %c0_i32_0 : i32, i32
  }
  func.func @transform_5(%arg0: i32) -> (i32, i32) {
    %c0_i32 = arith.constant 0 : i32
    %c0_i32_0 = arith.constant 0 : i32
    %c0_i32_1 = arith.constant 0 : i32
    return %c0_i32, %c0_i32_0 : i32, i32
  }
  func.func @transform_6(%arg0: i32) -> (i32, i32) {
    %c0_i32 = arith.constant 0 : i32
    %c0_i32_0 = arith.constant 0 : i32
    %c0_i32_1 = arith.constant 0 : i32
    return %c0_i32, %c0_i32_0 : i32, i32
  }
  func.func @transform_7(%arg0: i32) -> (i32, i32) {
    %c0_i32 = arith.constant 0 : i32
    %c0_i32_0 = arith.constant 0 : i32
    %c0_i32_1 = arith.constant 0 : i32
    return %c0_i32, %c0_i32_0 : i32, i32
  }
  func.func @transform_8(%arg0: i32) -> (i32, i32) {
    %c0_i32 = arith.constant 0 : i32
    %c0_i32_0 = arith.constant 0 : i32
    %c0_i32_1 = arith.constant 0 : i32
    return %c0_i32, %c0_i32_0 : i32, i32
  }
  func.func @transform_9(%arg0: i32) -> (i32, i32) {
    %c0_i32 = arith.constant 0 : i32
    %c0_i32_0 = arith.constant 0 : i32
    %c0_i32_1 = arith.constant 0 : i32
    return %c0_i32, %c0_i32_0 : i32, i32
  }
  func.func @transform_10(%arg0: i32) -> (i32, i32) {
    %c0_i32 = arith.constant 0 : i32
    %c0_i32_0 = arith.constant 0 : i32
    %c0_i32_1 = arith.constant 0 : i32
    return %c0_i32, %c0_i32_0 : i32, i32
  }
  func.func @transform_11(%arg0: i32) -> (i32, i32) {
    %c0_i32 = arith.constant 0 : i32
    %c0_i32_0 = arith.constant 0 : i32
    %c0_i32_1 = arith.constant 0 : i32
    return %c0_i32, %c0_i32_0 : i32, i32
  }
  func.func @transform_12(%arg0: i32) -> (i32, i32) {
    %c0_i32 = arith.constant 0 : i32
    %c0_i32_0 = arith.constant 0 : i32
    %c0_i32_1 = arith.constant 0 : i32
    return %c0_i32, %c0_i32_0 : i32, i32
  }
  func.func @transform_13(%arg0: i32) -> (i32, i32, i32) {
    %c0_i32 = arith.constant 0 : i32
    %c0_i32_0 = arith.constant 0 : i32
    %c0_i32_1 = arith.constant 0 : i32
    return %arg0, %c0_i32, %c0_i32_0 : i32, i32, i32
  }
}

</mosaic_0001>

<bundles_post_ra>
// kernel: tpu_custom_call.1
= control target key start
LH: loop header
LB: loop body
LE: loop exit
PB: predicated region body
PF: predicated region fallthrough
CT: control target
= control target key end

     0   :  { %s2063_s0 = inlined_call_operand.vmem [shape: f32[2,8,32], index: 0, kind: input, shape index: {}]   ;;  %s2064_s1 = inlined_call_operand.vmem [shape: bf16[32,96], index: 1, kind: input, shape index: {}]   ;;  %s2065_s2 = inlined_call_operand.vmem [shape: f32[1,96], index: 2, kind: input, shape index: {}]   ;;  %s2066_s3 = inlined_call_operand.vmem [shape: bf16[32,32], index: 3, kind: input, shape index: {}]   ;;  %s2067_s4 = inlined_call_operand.vmem [shape: f32[1,32], index: 4, kind: input, shape index: {}]   ;;  %s2068_s5 = inlined_call_operand.hbm [shape: bf16[32,64], index: 5, kind: input, shape index: {}]   ;;  %s2069_s6 = inlined_call_operand.vmem [shape: f32[1,64], index: 6, kind: input, shape index: {}]   ;;  %s2070_s7 = inlined_call_operand.vmem [shape: bf16[64,32], index: 7, kind: input, shape index: {}]   ;;  %s2071_s8 = inlined_call_operand.vmem [shape: f32[1,32], index: 8, kind: input, shape index: {}]   ;;  %s2072_s9 = inlined_call_operand.vmem [shape: f32[1,32], index: 9, kind: input, shape index: {}]   ;;  %s2073_s10 = inlined_call_operand.vmem [shape: f32[1,32], index: 10, kind: input, shape index: {}]   ;;  %s2074_s11 = inlined_call_operand.vmem [shape: f32[1,32], index: 11, kind: input, shape index: {}]   ;;  %s2075_s12 = inlined_call_operand.vmem [shape: f32[1,32], index: 12, kind: input, shape index: {}]   ;;  %s2076_s13 = inlined_call_operand.hbm [shape: f32[2,8,32], index: 13, kind: output, shape index: {}]  }
   0x1   :  { %2083 = sst [smem:[#allocation11_spill]] %s2063_s0 }
   0x2   :  { %18 = vsyncpa [#allocation3], 0 }
   0x3   :  { %19 = vsyncpa [#allocation4], 0 }
   0x4   :  { %21 = vsyncpa [#allocation4 + $0x1], 0  ;;  %s1786_s25 = smov 0   ;;  %s1788_s26 = smov 0  }
   0x5   :  { %s1790_s27 = smov 0   ;;  %s1792_s28 = smov 0  }
   0x6 LB: > { %2084 = sst [smem:[#allocation8_spill]] %s1690_s27  ;;  %s1807_s29 = sadd.s32 4294967295, %s1694_s28   ;;  %s1694_s28 = sphi %s1792_s28, %s2097_s28   ;;  %s1690_s27 = sphi %s1790_s27, %s2099_s27   ;;  %s1686_s26 = sphi %s1788_s26, %s2101_s26   ;;  %s1682_s25 = sphi %s1786_s25, %s2100_s25  }
   0x7   : > { %s1346_s30 = sadd.s32 4294967294, %s1694_s28   ;;  %s1811_s14 = sadd.s32 1, %s1694_s28  }
   0x8   : > { %2085 = sst [smem:[#allocation9_spill]] %s1811_s14  ;;  %s312_s15 = sadd.s32 1, %s1690_s27 }
   0x9   : > { %s309_s16 = ssub.s32 %s1694_s28, %s1811_s14  ;;  %p322_p0 = scmp.ne.s32.totalorder %s1690_s27, %s1686_s26 }
   0xa   : > { %p310_p1 = scmp.eq.s32.totalorder %s309_s16, 0  ;;  %p323_p2 = scmp.eq.s32.totalorder %s1807_s29, 1 }
   0xb   : > { %p328_p3 = scmp.ne.s32.totalorder %s1686_s26, %s1682_s25  ;;  %p329_p4 = scmp.eq.s32.totalorder %s1346_s30, 1 }
   0xc   : > { %s1822_s17 = scalar_select %p310_p1, %s1690_s27, %s312_s15  }
   0xd   : > { %p1824_p5 = por %p323_p2, %p322_p0  ;;  %p1828_p6 = por %p329_p4, %p328_p3 }
   0xe   : > { %2086 = sst [smem:[#allocation10_spill]] %s1822_s17  ;;  %p1347_p7 = scmp.ge.s32.totalorder %s1694_s28, 1 }
   0xf   : > { %s2087_s18 = scalar_select %p1824_p5, 1, 0 }
  0x10   : > { %s2088_s19 = scalar_select %p1828_p6, 1, 0 }
  0x11   : > { %p336_p8 = scmp.lt.s32.totalorder %s1694_s28, 3  ;;  %p2080_p9 = scmp.eq.s32.totalorder %s1807_s29, 0 }
  0x12   : > { %s1696_s21 = smov [#allocation2]   ;;  %s1600_s15 = scalar_lea.hbm %s2068_s5, 256 }
  0x13   : > { %p1835_p10 = pnand %p1347_p7, %p336_p8  ;;  %s360_s22 = sshll.u32 %s1696_s21, 4  ;;  %s361_s22 = int_to_ptr.vmem [resolvable:$true] %s360_s22 }
  0x14   : > { %p1601_p13 = scmp.ne.s32.totalorder %s2068_s5, %s1600_s15  ;;  %p1607_p3 = scmp.lt.u32.totalorder %s1600_s15, %s2068_s5 }
  0x15   : > { %s2089_s20 = scalar_select %p1835_p10, 1, 0 }
  0x16   : > { %p1508_p11 = pneg %p1835_p10 }
  0x18   : > { %p1843_p12 = pnand %p2080_p9, %p1508_p11 }
  0x1a   : > { %p1602_p0 = pneg %p1843_p12 }
  0x1c   : > { %p1603_p1 = pnand %p1602_p0, %p1601_p13 }
  0x1e   : > { %p1604_p2 = pneg %p1603_p1 }
  0x20   : > { %p1609_p4 = pnand %p1607_p3, %p1604_p2 }
  0x22   : > { %1612 = shalt.err (!%p1609_p4)
}
  0x23   : > { %s1613_s14 = scalar_lea.vmem %s361_s22, 256  ;;  %p1621_p9 = scmp.lt.s32.totalorder %s361_s22, %s361_s22 }
  0x24   : > { %p1614_p7 = scmp.ne.s32.totalorder %s361_s22, %s1613_s14  ;;  %p1622_p6 = scmp.lt.s32.totalorder %s1613_s14, %s1613_s14 }
  0x26   : > { %p1616_p8 = pnand %p1614_p7, %p1602_p0  ;;  %p1623_p5 = por %p1622_p6, %p1621_p9 }
  0x28   : > { %p1617_p11 = pneg %p1616_p8 }
  0x2a   : > { %p1624_p10 = pnand %p1623_p5, %p1617_p11 }
  0x2c   : > { %1627 = shalt.err (!%p1624_p10)
}
  0x2d   : > { %s1697_s17 = smov 64   ;;  %s1698_s24 = smov 4  }
  0x2e   : > { %1511 = dma.hbm_to_vmem [thread:$0]  (!%p1843_p12), %s2068_s5, 256, %s361_s22, [#allocation3], %s1697_s17, %s1697_s17, %s1698_s24  }
  0x2f   : > { %p2091_p13 = scmp.ne.s32.totalorder %s2089_s20, 0 }
  0x30   : > { %p2092_p1 = scmp.eq.s32.totalorder (!%p2091_p13), %s1807_s29, 0 }
  0x31   : > { %404 = sbr.rel (%p2091_p13) target bundleno = 2618 (0xa3a), region = 72 }
  0x38   : > { %1673 = dma.done.wait (%p2092_p1), [#allocation3], 256   ;;  %p2093_p0 = pmov %p2092_p1 }
  0x39   : > { %p447_p5 = scmp.lt.s32.totalorder %s1807_s29, 1  ;;  %v1699_v0 = vmov 0.0   ;;  %vm1700_vm0 = vmmov 0   ;;  %s2094_s0 = sld [smem:[#allocation11_spill]]  ;;  %v1570_v1 = vld [vmem:[%s2064_s1] sm:$0xff]   ;;  %v1571_v2 = vld [vmem:[%s2064_s1 + $0x8] sm:$0xff]  }
  0x3a   : > { %1675 = vsyncadd (%p2093_p0), [#allocation3], 4294967040  ;;  %1418 = vmatprep.subr.bf16.mxu0 %v1699_v0  ;;  %1422 = vmatprep.mubr.msk.bf16.mxu0 %vm1700_vm0, %v1699_v0  ;;  %vm477_vm1 = vcmask 261120   ;;  %v1354_v5 = vld [vmem:[%s2065_s2] ss:$0 sm:$0xff]  ;;  %s1703_s20 = smov 80  }
  0x3b   : > { %s448_s27 = scalar_select %p447_p5, %s1807_s29, 1  ;;  %1426 = vmatprep.subr.bf16.mxu1 %v1699_v0  ;;  %1428 = vmatprep.mubr.msk.bf16.mxu1 %vm1700_vm0, %v1699_v0  ;;  %vm525_vm2 = vcmask 64512   ;;  %vm589_vm3 = vcmask 1043456   ;;  %vm976_vm4 = vcmask 130048   ;;  %vm978_vm5 = vcmask 195584  }
  0x3c   : > { %1419 = vmatpush3.bf16.msra.mxu0 %v1570_v1  ;;  %s1704_s22 = smov 88   ;;  %s1706_s15 = smov 112   ;;  %vm1186_vm6 = vcmask 523264  }
  0x3d   : > { %s1353_s14 = sshll.u32 %s448_s27, 3  ;;  %1420 = vmatprep.subr.bf16.mxu0 %v1699_v0  ;;  %s1701_s27 = smov 120  }
  0x3e   : > { %s1707_s21 = smov 104   ;;  %s1708_s17 = smov 56  }
  0x3f   : > { %s450_s23 = scalar_lea.vmem %s2094_s0, %s1353_s14  ;;  %s1702_s14 = smov 96  }
  0x40   : > { %v1886_v3 = vld [vmem:[%s450_s23] sm:$0xff]  ;;  %1421 = vmatpush3.bf16.msra.mxu0 %v1571_v2  ;;  %s1705_s23 = smov 72   ;;  %s1709_s24 = smov 64  }
  0x41   : > { %v453_v4 = vpack.c.bf16 %v1886_v3, %v1886_v3  ;;  %1432 = vmatprep.subr.bf16.mxu0 %v1699_v0  ;;  %s1710_s30 = smov 40   ;;  %s1711_s16 = smov 48  }
  0x42   : > { %p2095_p9 = scmp.ne.s32.totalorder %s2087_s18, 0 }
  0x43   : > { %1423 = vmatmul.mubr.msk.bf16.vlgmr.msra.gmra.mrb[0].mxu0 %vm477_vm1, %v453_v4 }
  0x44   : > { %1434 = vmatprep.mubr.msk.bf16.mxu0 %vm1700_vm0, %v1699_v0 }
 0x116   : > { %v515_v6 = vpop.f32.mrb[0].mxu0 }
 0x117   : > { %v516_v7 = vadd.f32 %v1354_v5, %v515_v6  ;;  %v1424_v8 = vpop.f32.mrb[1].mxu0 }
 0x118   : > { %v518_v9 = vpop.f32.mrb[2].mxu0 }
 0x119   : > { %v1898_v10 = vpack.c.bf16 %v516_v7, %v516_v7  ;;  %v1425_v11 = vpop.f32.mrb[3].mxu0 }
 0x11b   : > { %633 = vrot.lane.b32.xlu1 %v1898_v10, %s1701_s27  ;;  %523 = vrot.lane.b32.xlu0 %v1898_v10, %s1702_s14  ;;  %s1712_s27 = smov 8  }
 0x11f   : > { %745 = vrot.lane.b32.xlu1 %v1898_v10, %s1703_s20  ;;  %635 = vrot.lane.b32.xlu0 %v1898_v10, %s1704_s22  ;;  %s444_s22 = sand.u32 1, %s1686_s26  }
 0x123   : > { %855 = vrot.lane.b32.xlu1 %v1898_v10, %s1705_s23  ;;  %743 = vrot.lane.b32.xlu0 %v1898_v10, %s1706_s15  ;;  %s1713_s15 = smov 16   ;;  %s1352_s23 = sshll.u32 %s444_s22, 3 }
 0x127   : > { %853 = vrot.lane.b32.xlu0 %v1898_v10, %s1707_s21  ;;  %s1714_s21 = smov 24  }
 0x18d   : > { %v524_v12 = vpop.permute.xlu0 %523  ;;  %v634_v15 = vpop.permute.xlu1 %633 }
 0x18e   : > { %v530_v13 = vsel %vm525_vm2, %v524_v12, 0 }
 0x18f   : > { %1427 = vmatpush3.bf16.xpose.msra.mxu1 %v530_v13 }
 0x190   : > { %1438 = vmatprep.subr.bf16.mxu1 %v1699_v0 }
 0x191   : > { %v636_v14 = vpop.permute.xlu0 %635  ;;  %v746_v17 = vpop.permute.xlu1 %745 }
 0x192   : > { %v641_v16 = vsel %vm525_vm2, %v636_v14, 0  ;;  %v751_v18 = vsel %vm525_vm2, %v746_v17, 0 }
 0x195   : > { %v856_v19 = vpop.permute.xlu1 %855  ;;  %v744_v20 = vpop.permute.xlu0 %743 }
 0x196   : > { %1429 = vmatmul.mubr.msk.bf16.vlgmr.msra.gmra.mrb[0].mxu1 %vm525_vm2, %v1898_v10  ;;  %v861_v21 = vsel %vm525_vm2, %v856_v19, 0 }
 0x197   : > { %1439 = vmatpush3.bf16.xpose.msra.mxu1 %v641_v16  ;;  %1440 = vmatprep.mubr.msk.bf16.mxu1 %vm1700_vm0, %v1699_v0 }
 0x198   : > { %1450 = vmatprep.subr.bf16.mxu1 %v1699_v0 }
 0x199   : > { %v854_v22 = vpop.permute.xlu0 %853 }
 0x19e   : > { %1441 = vmatmul.mubr.msk.bf16.vlgmr.msra.gmra.mrb[4].mxu1 %vm525_vm2, %v634_v15 }
 0x19f   : > { %1451 = vmatpush3.bf16.xpose.msra.mxu1 %v751_v18  ;;  %1452 = vmatprep.mubr.msk.bf16.mxu1 %vm1700_vm0, %v1699_v0 }
 0x1a0   : > { %1462 = vmatprep.subr.bf16.mxu1 %v1699_v0 }
 0x1a6   : > { %1453 = vmatmul.mubr.msk.bf16.vlgmr.msra.gmra.mrb[8].mxu1 %vm525_vm2, %v744_v20 }
 0x1a7   : > { %1463 = vmatpush3.bf16.xpose.msra.mxu1 %v861_v21  ;;  %1464 = vmatprep.mubr.msk.bf16.mxu1 %vm1700_vm0, %v1699_v0 }
 0x1a8   : > { %1474 = vmatprep.subr.bf16.mxu1 %v1699_v0 }
 0x1ae   : > { %1465 = vmatmul.mubr.msk.bf16.vlgmr.msra.gmra.mrb[12].mxu1 %vm525_vm2, %v854_v22 }
 0x1af   : > { %1478 = vmatprep.mubr.msk.bf16.mxu1 %vm1700_vm0, %v1699_v0 }
 0x269   : > { %v566_v23 = vpop.f32.mrb[0].mxu1 }
 0x26a   : > { %v1430_v24 = vpop.f32.mrb[1].mxu1  ;;  %v572_v25 = vsel %vm525_vm2, %v566_v23, -inf }
 0x26b   : > { %573 = vmax.xlane.f32.xlu1 %v572_v25  ;;  %v569_v26 = vpop.f32.mrb[2].mxu1 }
 0x26c   : > { %v1431_v27 = vpop.f32.mrb[3].mxu1 }
 0x271   : > { %v677_v28 = vpop.f32.mrb[4].mxu1 }
 0x272   : > { %v1442_v29 = vpop.f32.mrb[5].mxu1  ;;  %v683_v30 = vsel %vm525_vm2, %v677_v28, -inf }
 0x273   : > { %684 = vmax.xlane.f32.xlu0 %v683_v30  ;;  %v680_v31 = vpop.f32.mrb[6].mxu1 }
 0x274   : > { %v1443_v32 = vpop.f32.mrb[7].mxu1 }
 0x279   : > { %v787_v33 = vpop.f32.mrb[8].mxu1 }
 0x27a   : > { %v1454_v34 = vpop.f32.mrb[9].mxu1  ;;  %v793_v35 = vsel %vm525_vm2, %v787_v33, -inf }
 0x27b   : > { %794 = vmax.xlane.f32.xlu0 %v793_v35  ;;  %v790_v36 = vpop.f32.mrb[10].mxu1  ;;  %v1573_v34 = vld [vmem:[%s2066_s3 + $0x8] sm:$0xff]  }
 0x27c   : > { %v1455_v37 = vpop.f32.mrb[11].mxu1 }
 0x281   : > { %v897_v38 = vpop.f32.mrb[12].mxu1 }
 0x282   : > { %v1466_v39 = vpop.f32.mrb[13].mxu1  ;;  %v903_v40 = vsel %vm525_vm2, %v897_v38, -inf }
 0x283   : > { %904 = vmax.xlane.f32.xlu1 %v903_v40  ;;  %v900_v41 = vpop.f32.mrb[14].mxu1 }
 0x284   : > { %v1467_v42 = vpop.f32.mrb[15].mxu1 }
 0x2f8   : > { %v574_v43 = vpop.xlane.xlu1 %573 }
 0x2f9   : > { %v575_v44 = vsub.f32 %v566_v23, %v574_v43 }
 0x2fb   : > { %v576_v45 = vmul.f32 1.442695, %v575_v44 }
 0x2fd   : > { %1580 = vpow2.f32 %v576_v45 }
 0x300   : > { %v685_v46 = vpop.xlane.xlu0 %684 }
 0x301   : > { %v686_v47 = vsub.f32 %v677_v28, %v685_v46 }
 0x303   : > { %v687_v48 = vmul.f32 1.442695, %v686_v47 }
 0x305   : > { %1582 = vpow2.f32 %v687_v48 }
 0x307   : > { %v1581_v49 = vpop.eup %1580 }
 0x308   : > { %v795_v50 = vpop.xlane.xlu0 %794  ;;  %v578_v51 = vsel %vm525_vm2, %v1581_v49, 0.0 }
 0x309   : > { %v796_v52 = vsub.f32 %v787_v33, %v795_v50  ;;  %579 = vadd.xlane.f32.xlu0 %v578_v51  ;;  %v1572_v33 = vld [vmem:[%s2066_s3] sm:$0xff]  }
 0x30a   : > { %1475 = vmatpush3.bf16.msra.mxu1 %v1572_v33  ;;  %v1366_v50 = vld [vmem:[%s2067_s4] ss:$0 sm:$0xff] }
 0x30b   : > { %v797_v53 = vmul.f32 1.442695, %v796_v52  ;;  %1476 = vmatprep.subr.bf16.mxu1 %v1699_v0 }
 0x30d   : > { %1584 = vpow2.f32 %v797_v53 }
 0x30e   : > { %1477 = vmatpush3.bf16.msra.mxu1 %v1573_v34 }
 0x30f   : > { %v1583_v54 = vpop.eup %1582  ;;  %1490 = vmatprep.subr.bf16.mxu1 %v1699_v0 }
 0x310   : > { %v689_v55 = vsel %vm525_vm2, %v1583_v54, 0.0  ;;  %v905_v58 = vpop.xlane.xlu1 %904 }
 0x311   : > { %690 = vadd.xlane.f32.xlu1 %v689_v55  ;;  %v906_v59 = vsub.f32 %v897_v38, %v905_v58 }
 0x313   : > { %v907_v60 = vmul.f32 1.442695, %v906_v59 }
 0x315   : > { %1586 = vpow2.f32 %v907_v60 }
 0x317   : > { %v1585_v56 = vpop.eup %1584 }
 0x318   : > { %v799_v57 = vsel %vm525_vm2, %v1585_v56, 0.0 }
 0x319   : > { %800 = vadd.xlane.f32.xlu0 %v799_v57 }
 0x31f   : > { %v1587_v61 = vpop.eup %1586 }
 0x320   : > { %v909_v62 = vsel %vm525_vm2, %v1587_v61, 0.0 }
 0x322   : > { %695 = vrot.lane.b32.xlu1 %v1898_v10, %s1708_s17 }
 0x32f   : > { %584 = vrot.lane.b32.xlu0 %v1898_v10, %s1709_s24 }
 0x333   : > { %915 = vrot.lane.b32.xlu0 %v1898_v10, %s1710_s30  ;;  %s1385_s30 = sshll.u32 %s1807_s29, 7  ;;  %s1715_s29 = smov [#allocation5]  }
 0x334   : > { %s2020_s0 = scalar_lea.hbm %s2076_s13, %s1385_s30 }
 0x346   : > { %910 = vadd.xlane.f32.xlu1 %v909_v62 }
 0x357   : > { %805 = vrot.lane.b32.xlu1 %v1898_v10, %s1711_s16  ;;  %s446_s16 = scalar_lea.vmem [#allocation5], %s1352_s23  ;;  %s1632_s23 = sshll.u32 %s1715_s29, 4  ;;  %s1633_s23 = int_to_ptr.vmem [resolvable:$false] %s1632_s23 }
 0x358   : > { %s1634_s17 = scalar_lea.vmem %s1633_s23, 256 }
 0x396   : > { %v580_v63 = vpop.xlane.xlu0 %579 }
 0x397   : > { %1588 = vrcp.f32 %v580_v63  ;;  %v1574_v63 = vld [vmem:[#allocation2] sm:$0xff]  }
 0x39e   : > { %v691_v1 = vpop.xlane.xlu1 %690 }
 0x39f   : > { %1590 = vrcp.f32 %v691_v1  ;;  %v1575_v1 = vld [vmem:[#allocation2 + $0x8] sm:$0xff]  }
 0x3a1   : > { %v1589_v2 = vpop.eup %1588 }
 0x3a2   : > { %v582_v5 = vmul.f32 %v1589_v2, %v1581_v49  ;;  %v696_v8 = vpop.permute.xlu1 %695  ;;  %v1577_v2 = vld [vmem:[%s2070_s7 + $0x8] sm:$0xff]  }
 0x3a3   : > { %v701_v12 = vsel %vm589_vm3, %v696_v8, 0  ;;  %v1370_v8 = vld [vmem:[%s2072_s9] ss:$0 sm:$0xff] }
 0x3a4   : > { %v583_v9 = vpack.c.bf16 %v582_v5, %v582_v5 }
 0x3a6   : > { %v801_v4 = vpop.xlane.xlu0 %800 }
 0x3a7   : > { %1592 = vrcp.f32 %v801_v4 }
 0x3a9   : > { %v1591_v11 = vpop.eup %1590 }
 0x3aa   : > { %v585_v6 = vpop.permute.xlu0 %584  ;;  %v693_v10 = vmul.f32 %v1591_v11, %v1583_v54  ;;  %v1371_v11 = vld [vmem:[%s2073_s10] ss:$0 sm:$0xff] }
 0x3ab   : > { %v591_v7 = vsel %vm589_vm3, %v585_v6, 0 }
 0x3ac   : > { %1433 = vmatpush3.bf16.msra.mxu0 %v591_v7  ;;  %v694_v13 = vpack.c.bf16 %v693_v10, %v693_v10 }
 0x3ad   : > { %1444 = vmatprep.subr.bf16.mxu0 %v1699_v0 }
 0x3ae   : > { %v916_v19 = vpop.permute.xlu0 %915 }
 0x3af   : > { %1435 = vmatmul.mubr.msk.bf16.vlgmr.msra.gmra.mrb[4].mxu0 %vm525_vm2, %v583_v9  ;;  %v921_v21 = vsel %vm589_vm3, %v916_v19, 0 }
 0x3b0   : > { %1445 = vmatpush3.bf16.msra.mxu0 %v701_v12  ;;  %1446 = vmatprep.mubr.msk.bf16.mxu0 %vm1700_vm0, %v1699_v0 }
 0x3b1   : > { %1456 = vmatprep.subr.bf16.mxu0 %v1699_v0  ;;  %v1593_v14 = vpop.eup %1592 }
 0x3b2   : > { %v803_v16 = vmul.f32 %v1593_v14, %v1585_v56  ;;  %v1578_v14 = vld [vmem:[%s2070_s7 + $0x10] sm:$0xff]  }
 0x3b4   : > { %v804_v20 = vpack.c.bf16 %v803_v16, %v803_v16  ;;  %v1372_v16 = vld [vmem:[%s2069_s6] ss:$0 sm:$0xff] }
 0x3b7   : > { %1447 = vmatmul.mubr.msk.bf16.vlgmr.msra.gmra.mrb[8].mxu0 %vm525_vm2, %v694_v13 }
 0x3b8   : > { %1458 = vmatprep.mubr.msk.bf16.mxu0 %vm1700_vm0, %v1699_v0 }
 0x3d3   : > { %v911_v15 = vpop.xlane.xlu1 %910 }
 0x3d4   : > { %1594 = vrcp.f32 %v911_v15  ;;  %v1579_v15 = vld [vmem:[%s2070_s7 + $0x18] sm:$0xff]  }
 0x3d7   : > { %v806_v17 = vpop.permute.xlu1 %805 }
 0x3d8   : > { %v811_v18 = vsel %vm589_vm3, %v806_v17, 0 }
 0x3d9   : > { %1457 = vmatpush3.bf16.msra.mxu0 %v811_v18 }
 0x3da   : > { %1468 = vmatprep.subr.bf16.mxu0 %v1699_v0 }
 0x3dc   : > { %1459 = vmatmul.mubr.msk.bf16.vlgmr.msra.gmra.mrb[12].mxu0 %vm525_vm2, %v804_v20 }
 0x3dd   : > { %1469 = vmatpush3.bf16.msra.mxu0 %v921_v21  ;;  %1470 = vmatprep.mubr.msk.bf16.mxu0 %vm1700_vm0, %v1699_v0 }
 0x3de   : > { %v1595_v22 = vpop.eup %1594  ;;  %1482 = vmatprep.subr.bf16.mxu0 %v1699_v0 }
 0x3df   : > { %v913_v23 = vmul.f32 %v1595_v22, %v1587_v61 }
 0x3e1   : > { %v914_v24 = vpack.c.bf16 %v913_v23, %v913_v23 }
 0x3e4   : > { %1471 = vmatmul.mubr.msk.bf16.vlgmr.msra.gmra.mrb[16].mxu0 %vm525_vm2, %v914_v24 }
 0x3e5   : > { %1486 = vmatprep.mubr.msk.bf16.mxu0 %vm1700_vm0, %v1699_v0  ;;  %1483 = vmatpush3.bf16.msra.mxu0 %v1574_v63 }
 0x3e6   : > { %1484 = vmatprep.subr.bf16.mxu0 %v1699_v0 }
 0x3e9   : > { %1485 = vmatpush3.bf16.msra.mxu0 %v1575_v1 }
 0x482   : > { %v627_v25 = vpop.f32.mrb[4].mxu0 }
 0x483   : > { %v1436_v26 = vpop.f32.mrb[5].mxu0 }
 0x484   : > { %v630_v27 = vpop.f32.mrb[6].mxu0 }
 0x485   : > { %v1437_v28 = vpop.f32.mrb[7].mxu0 }
 0x48a   : > { %v737_v29 = vpop.f32.mrb[8].mxu0 }
 0x48b   : > { %964 = vrot.lane.b32.xlu1 %v737_v29, %s1712_s27  ;;  %v1448_v30 = vpop.f32.mrb[9].mxu0  ;;  %s1275_s27 = sshll.u32 %s446_s16, 4  ;;  %s2022_s27 = int_to_ptr.vmem [resolvable:$true] %s1275_s27 }
 0x48c   : > { %v740_v31 = vpop.f32.mrb[10].mxu0  ;;  %p1635_p2 = scmp.lt.s32.totalorder %s2022_s27, %s1633_s23 }
 0x48d   : > { %v1449_v32 = vpop.f32.mrb[11].mxu0 }
 0x4af   : > { %v847_v35 = vpop.f32.mrb[12].mxu0 }
 0x4b0   : > { %968 = vrot.lane.b32.xlu0 %v847_v35, %s1713_s15  ;;  %v1460_v36 = vpop.f32.mrb[13].mxu0  ;;  %s1262_s15 = scalar_lea.sflag [#allocation4], %s444_s22 }
 0x4b1   : > { %v850_v37 = vpop.f32.mrb[14].mxu0 }
 0x4b2   : > { %v1461_v38 = vpop.f32.mrb[15].mxu0 }
 0x4b7   : > { %v957_v39 = vpop.f32.mrb[16].mxu0 }
 0x4b8   : > { %972 = vrot.lane.b32.xlu1 %v957_v39, %s1714_s21  ;;  %v1472_v40 = vpop.f32.mrb[17].mxu0  ;;  %s1628_s21 = scalar_lea.vmem %s2022_s27, 128 }
 0x4b9   : > { %v960_v41 = vpop.f32.mrb[18].mxu0  ;;  %v1382_v40 = vld [vmem:[%s2074_s11] ss:$0 sm:$0xff]  ;;  %p1629_p6 = scmp.ne.s32.totalorder %s2022_s27, %s1628_s21  ;;  %p1636_p3 = scmp.lt.s32.totalorder %s1634_s17, %s1628_s21 }
 0x4ba   : > { %v1473_v42 = vpop.f32.mrb[19].mxu0 }
 0x4bb   : > { %v1383_v42 = vld [vmem:[%s2075_s12] ss:$0 sm:$0xff]  ;;  %p1630_p10 = pnand %p1629_p6, %p2095_p9  ;;  %p1637_p4 = por %p1636_p3, %p1635_p2 }
 0x4bd   : > { %p1631_p12 = pneg %p1630_p10 }
 0x4bf   : > { %p1638_p7 = pnand %p1637_p4, %p1631_p12 }
 0x4fd   : > { %v965_v43 = vpop.permute.xlu1 %964 }
 0x4fe   : > { %v975_v45 = vsel %vm525_vm2, %v627_v25, %v965_v43 }
 0x522   : > { %v969_v44 = vpop.permute.xlu0 %968 }
 0x523   : > { %v977_v46 = vsel %vm976_vm4, %v975_v45, %v969_v44 }
 0x52a   : > { %v973_v47 = vpop.permute.xlu1 %972 }
 0x52b   : > { %v979_v48 = vsel %vm978_vm5, %v977_v46, %v973_v47 }
 0x52c   : > { %v980_v49 = vpack.c.bf16 %v979_v48, %v979_v48 }
 0x52e   : > { %1479 = vmatmul.mubr.msk.bf16.vlgmr.msra.gmra.mrb[16].mxu1 %vm477_vm1, %v980_v49 }
 0x52f   : > { %1498 = vmatprep.mubr.msk.bf16.mxu1 %vm1700_vm0, %v1699_v0 }
 0x601   : > { %v1041_v51 = vpop.f32.mrb[16].mxu1 }
 0x602   : > { %v1042_v52 = vadd.f32 %v1366_v50, %v1041_v51  ;;  %v1480_v53 = vpop.f32.mrb[17].mxu1 }
 0x603   : > { %v1044_v54 = vpop.f32.mrb[18].mxu1 }
 0x604   : > { %v1481_v55 = vpop.f32.mrb[19].mxu1  ;;  %v1047_v56 = vadd.f32 %v1042_v52, %v1886_v3  ;;  %v1576_v3 = vld [vmem:[%s2070_s7] sm:$0xff]  }
 0x605   : > { %1491 = vmatpush3.bf16.msra.mxu1 %v1576_v3 }
 0x606   : > { %v1048_v57 = vsel %vm477_vm1, %v1047_v56, 0.0  ;;  %1492 = vmatprep.subr.bf16.mxu1 %v1699_v0 }
 0x607   : > { %1049 = vadd.xlane.f32.xlu0 %v1048_v57 }
 0x609   : > { %1493 = vmatpush3.bf16.msra.mxu1 %v1577_v2 }
 0x60a   : > { %1494 = vmatprep.subr.bf16.mxu1 %v1699_v0 }
 0x60d   : > { %1495 = vmatpush3.bf16.msra.mxu1 %v1578_v14 }
 0x60e   : > { %1496 = vmatprep.subr.bf16.mxu1 %v1699_v0  ;;  %v1376_v0 = vld [vmem:[%s2071_s8] ss:$0 sm:$0xff] }
 0x611   : > { %1497 = vmatpush3.bf16.msra.mxu1 %v1579_v15 }
 0x694   : > { %v1050_v58 = vpop.xlane.xlu0 %1049 }
 0x695   : > { %v1052_v59 = vmul.f32 0.03125, %v1050_v58 }
 0x697   : > { %v1053_v60 = vsub.f32 %v1047_v56, %v1052_v59 }
 0x699   : > { %v1054_v61 = vmul.f32 %v1053_v60, %v1053_v60 }
 0x69b   : > { %v1055_v62 = vsel %vm477_vm1, %v1054_v61, 0.0 }
 0x69c   : > { %1056 = vadd.xlane.f32.xlu1 %v1055_v62 }
 0x729   : > { %v1057_v4 = vpop.xlane.xlu1 %1056 }
 0x72a   : > { %v1058_v5 = vmul.f32 0.03125, %v1057_v4 }
 0x72c   : > { %v1059_v6 = vadd.f32 1e-05, %v1058_v5 }
 0x72e   : > { %1596 = vrsqrt.f32 %v1059_v6 }
 0x738   : > { %v1597_v7 = vpop.eup %1596 }
 0x739   : > { %v1061_v9 = vmul.f32 %v1597_v7, %v1053_v60 }
 0x73b   : > { %v1069_v12 = vmul.f32 %v1370_v8, %v1061_v9 }
 0x73d   : > { %v1077_v10 = vadd.f32 %v1371_v11, %v1069_v12 }
 0x73f   : > { %v1078_v13 = vpack.c.bf16 %v1077_v10, %v1077_v10 }
 0x741   : > { %1487 = vmatmul.mubr.msk.bf16.vlgmr.msra.gmra.mrb[20].mxu0 %vm477_vm1, %v1078_v13 }
 0x814   : > { %v1139_v17 = vpop.f32.mrb[20].mxu0 }
 0x815   : > { %v1140_v18 = vadd.f32 %v1372_v16, %v1139_v17  ;;  %v1488_v19 = vpop.f32.mrb[21].mxu0 }
 0x816   : > { %v1142_v20 = vpop.f32.mrb[22].mxu0 }
 0x817   : > { %v1145_v21 = vmax.f32 %v1140_v18, 0.0  ;;  %v1489_v22 = vpop.f32.mrb[23].mxu0 }
 0x819   : > { %v1146_v23 = vpack.c.bf16 %v1145_v21, %v1145_v21 }
 0x81b   : > { %1499 = vmatmul.mubr.msk.bf16.vlgmr.msra.gmra.mrb[20].mxu1 %vm1186_vm6, %v1146_v23 }
 0x8ee   : > { %v1224_v24 = vpop.f32.mrb[20].mxu1 }
 0x8ef   : > { %v1225_v25 = vadd.f32 %v1376_v0, %v1224_v24  ;;  %v1500_v26 = vpop.f32.mrb[21].mxu1 }
 0x8f0   : > { %v1227_v27 = vpop.f32.mrb[22].mxu1 }
 0x8f1   : > { %v1501_v28 = vpop.f32.mrb[23].mxu1  ;;  %v1230_v29 = vadd.f32 %v1225_v25, %v1077_v10 }
 0x8f3   : > { %v1231_v30 = vsel %vm477_vm1, %v1230_v29, 0.0 }
 0x8f4   : > { %1232 = vadd.xlane.f32.xlu0 %v1231_v30 }
 0x981   : > { %v1233_v31 = vpop.xlane.xlu0 %1232 }
 0x982   : > { %v1234_v32 = vmul.f32 0.03125, %v1233_v31 }
 0x984   : > { %v1235_v33 = vsub.f32 %v1230_v29, %v1234_v32 }
 0x986   : > { %v1236_v34 = vmul.f32 %v1235_v33, %v1235_v33 }
 0x988   : > { %v1237_v35 = vsel %vm477_vm1, %v1236_v34, 0.0 }
 0x989   : > { %1238 = vadd.xlane.f32.xlu0 %v1237_v35 }
 0xa16   : > { %v1239_v36 = vpop.xlane.xlu0 %1238 }
 0xa17   : > { %v1240_v37 = vmul.f32 0.03125, %v1239_v36 }
 0xa19   : > { %v1241_v38 = vadd.f32 1e-05, %v1240_v37 }
 0xa1b   : > { %1598 = vrsqrt.f32 %v1241_v38 }
 0xa25   : > { %v1599_v39 = vpop.eup %1598 }
 0xa26   : > { %v1243_v41 = vmul.f32 %v1599_v39, %v1235_v33 }
 0xa28   : > { %v1251_v43 = vmul.f32 %v1382_v40, %v1243_v41 }
 0xa2a   : > { %v1259_v44 = vadd.f32 %v1383_v42, %v1251_v43 }
 0xa2c   : > { %1260 = vst.msk [vmem:[%s446_s16] sm:$0xff] %vm477_vm1, %v1259_v44 }
 0xa2d   : > { %1641 = shalt.err (!%p1638_p7)
}
 0xa2e   : > { %s1642_s22 = scalar_lea.hbm %s2020_s0, 128  ;;  %s1646_s16 = scalar_lea.hbm %s2076_s13, 256 }
 0xa2f   : > { %p1643_p8 = scmp.ne.s32.totalorder %s2020_s0, %s1642_s22  ;;  %p1647_p1 = scmp.lt.u32.totalorder %s2020_s0, %s2076_s13 }
 0xa30   : > { %p1648_p0 = scmp.lt.u32.totalorder %s1646_s16, %s1642_s22  ;;  %p1650_p6 = scmp.lt.u32.totalorder %s1642_s22, %s2020_s0 }
 0xa31   : > { %p1644_p11 = pnand %p1643_p8, %p2095_p9 }
 0xa32   : > { %p1649_p5 = por %p1648_p0, %p1647_p1 }
 0xa33   : > { %p1645_p13 = pneg %p1644_p11 }
 0xa34   : > { %p1651_p10 = por %p1650_p6, %p1649_p5 }
 0xa36   : > { %p1652_p12 = pnand %p1651_p10, %p1645_p13 }
 0xa38   : > { %1655 = shalt.err (!%p1652_p12)
}
 0xa39   : > { %1506 = dma.vmem_to_hbm [thread:$0]  (%p2095_p9), %s2022_s27, 128, %s2020_s0, %s1262_s15  }
 0xa3a PF: > { %p1518_p2 = scmp.ge.s32.totalorder %s1694_s28, 2  ;;  %s1287_s21 = sand.u32 1, %s1682_s25  }
 0xa3b   : > { %p2096_p3 = scmp.ne.s32.totalorder %s2088_s19, 0  ;;  %s1288_s29 = scalar_lea.sflag [#allocation4], %s1287_s21 }
 0xa3d   : > { %p1513_p4 = pnand %p1518_p2, %p2096_p3 }
 0xa3f   : > { %1677 = dma.done.wait (!%p1513_p4), %s1288_s29, 128  }
 0xa40   : > { %1679 = vsyncadd (!%p1513_p4), %s1288_s29, 4294967168  ;;  %s2097_s28 = sld [smem:[#allocation9_spill]]  ;;  %s2098_s23 = sld [smem:[#allocation8_spill]] }
 0xa41   : > { %s2099_s27 = sld [smem:[#allocation10_spill]]  ;;  %s2100_s25 = smov %s1686_s26 }
 0xa46   : > { %p24_p7 = scmp.ge.s32.totalorder %s2097_s28, 4   ;;  %s2101_s26 = smov %s2098_s23 }
 0xa48   :  { %26 = sbr.rel (!%p24_p7) target bundleno = 6 (0x6), region = 112 }
 0xa4f   :  { %1293 = vsyncpa [#allocation3], 1 }
 0xa50   :  { %1295 = vsyncpa [#allocation3 + $0x1], 1 }
 0xa51   :  { %1296 = vsyncpa [#allocation4], 1 }
 0xa52   :  { %1298 = vsyncpa [#allocation4 + $0x1], 1 }

// kernel: tpu_custom_call.1
= control target key start
LH: loop header
LB: loop body
LE: loop exit
PB: predicated region body
PF: predicated region fallthrough
CT: control target
= control target key end

     0   :  { %s2063_s0 = inlined_call_operand.vmem [shape: f32[2,8,32], index: 0, kind: input, shape index: {}]   ;;  %s2064_s1 = inlined_call_operand.vmem [shape: bf16[32,96], index: 1, kind: input, shape index: {}]   ;;  %s2065_s2 = inlined_call_operand.vmem [shape: f32[1,96], index: 2, kind: input, shape index: {}]   ;;  %s2066_s3 = inlined_call_operand.vmem [shape: bf16[32,32], index: 3, kind: input, shape index: {}]   ;;  %s2067_s4 = inlined_call_operand.vmem [shape: f32[1,32], index: 4, kind: input, shape index: {}]   ;;  %s2068_s5 = inlined_call_operand.hbm [shape: bf16[32,64], index: 5, kind: input, shape index: {}]   ;;  %s2069_s6 = inlined_call_operand.vmem [shape: f32[1,64], index: 6, kind: input, shape index: {}]   ;;  %s2070_s7 = inlined_call_operand.vmem [shape: bf16[64,32], index: 7, kind: input, shape index: {}]   ;;  %s2071_s8 = inlined_call_operand.vmem [shape: f32[1,32], index: 8, kind: input, shape index: {}]   ;;  %s2072_s9 = inlined_call_operand.vmem [shape: f32[1,32], index: 9, kind: input, shape index: {}]   ;;  %s2073_s10 = inlined_call_operand.vmem [shape: f32[1,32], index: 10, kind: input, shape index: {}]   ;;  %s2074_s11 = inlined_call_operand.vmem [shape: f32[1,32], index: 11, kind: input, shape index: {}]   ;;  %s2075_s12 = inlined_call_operand.vmem [shape: f32[1,32], index: 12, kind: input, shape index: {}]   ;;  %s2076_s13 = inlined_call_operand.hbm [shape: f32[2,8,32], index: 13, kind: output, shape index: {}]  }
   0x1   :  { %2083 = sst [smem:[#allocation11_spill]] %s2063_s0 }
   0x2   :  { %18 = vsyncpa [#allocation3], 0 }
   0x3   :  { %19 = vsyncpa [#allocation4], 0 }
   0x4   :  { %21 = vsyncpa [#allocation4 + $0x1], 0  ;;  %s1786_s25 = smov 0   ;;  %s1788_s26 = smov 0  }
   0x5   :  { %s1790_s27 = smov 0   ;;  %s1792_s28 = smov 0  }
   0x6 LB: > { %2084 = sst [smem:[#allocation8_spill]] %s1690_s27  ;;  %s1807_s29 = sadd.s32 4294967295, %s1694_s28   ;;  %s1694_s28 = sphi %s1792_s28, %s2097_s28   ;;  %s1690_s27 = sphi %s1790_s27, %s2099_s27   ;;  %s1686_s26 = sphi %s1788_s26, %s2101_s26   ;;  %s1682_s25 = sphi %s1786_s25, %s2100_s25  }
   0x7   : > { %s1346_s30 = sadd.s32 4294967294, %s1694_s28   ;;  %s1811_s14 = sadd.s32 1, %s1694_s28  }
   0x8   : > { %2085 = sst [smem:[#allocation9_spill]] %s1811_s14  ;;  %s312_s15 = sadd.s32 1, %s1690_s27 }
   0x9   : > { %s309_s16 = ssub.s32 %s1694_s28, %s1811_s14  ;;  %p322_p0 = scmp.ne.s32.totalorder %s1690_s27, %s1686_s26 }
   0xa   : > { %p310_p1 = scmp.eq.s32.totalorder %s309_s16, 0  ;;  %p323_p2 = scmp.eq.s32.totalorder %s1807_s29, 1 }
   0xb   : > { %p328_p3 = scmp.ne.s32.totalorder %s1686_s26, %s1682_s25  ;;  %p329_p4 = scmp.eq.s32.totalorder %s1346_s30, 1 }
   0xc   : > { %s1822_s17 = scalar_select %p310_p1, %s1690_s27, %s312_s15  }
   0xd   : > { %p1824_p5 = por %p323_p2, %p322_p0  ;;  %p1828_p6 = por %p329_p4, %p328_p3 }
   0xe   : > { %2086 = sst [smem:[#allocation10_spill]] %s1822_s17  ;;  %p1347_p7 = scmp.ge.s32.totalorder %s1694_s28, 1 }
   0xf   : > { %s2087_s18 = scalar_select %p1824_p5, 1, 0 }
  0x10   : > { %s2088_s19 = scalar_select %p1828_p6, 1, 0 }
  0x11   : > { %p336_p8 = scmp.lt.s32.totalorder %s1694_s28, 3  ;;  %p2080_p9 = scmp.eq.s32.totalorder %s1807_s29, 0 }
  0x12   : > { %s1696_s21 = smov [#allocation2]   ;;  %s1600_s15 = scalar_lea.hbm %s2068_s5, 256 }
  0x13   : > { %p1835_p10 = pnand %p1347_p7, %p336_p8  ;;  %s360_s22 = sshll.u32 %s1696_s21, 4  ;;  %s361_s22 = int_to_ptr.vmem [resolvable:$true] %s360_s22 }
  0x14   : > { %p1601_p13 = scmp.ne.s32.totalorder %s2068_s5, %s1600_s15  ;;  %p1607_p3 = scmp.lt.u32.totalorder %s1600_s15, %s2068_s5 }
  0x15   : > { %s2089_s20 = scalar_select %p1835_p10, 1, 0 }
  0x16   : > { %p1508_p11 = pneg %p1835_p10 }
  0x18   : > { %p1843_p12 = pnand %p2080_p9, %p1508_p11 }
  0x1a   : > { %p1602_p0 = pneg %p1843_p12 }
  0x1c   : > { %p1603_p1 = pnand %p1602_p0, %p1601_p13 }
  0x1e   : > { %p1604_p2 = pneg %p1603_p1 }
  0x20   : > { %p1609_p4 = pnand %p1607_p3, %p1604_p2 }
  0x22   : > { %1612 = shalt.err (!%p1609_p4)
}
  0x23   : > { %s1613_s14 = scalar_lea.vmem %s361_s22, 256  ;;  %p1621_p9 = scmp.lt.s32.totalorder %s361_s22, %s361_s22 }
  0x24   : > { %p1614_p7 = scmp.ne.s32.totalorder %s361_s22, %s1613_s14  ;;  %p1622_p6 = scmp.lt.s32.totalorder %s1613_s14, %s1613_s14 }
  0x26   : > { %p1616_p8 = pnand %p1614_p7, %p1602_p0  ;;  %p1623_p5 = por %p1622_p6, %p1621_p9 }
  0x28   : > { %p1617_p11 = pneg %p1616_p8 }
  0x2a   : > { %p1624_p10 = pnand %p1623_p5, %p1617_p11 }
  0x2c   : > { %1627 = shalt.err (!%p1624_p10)
}
  0x2d   : > { %s1697_s17 = smov 64   ;;  %s1698_s24 = smov 4  }
  0x2e   : > { %1511 = dma.hbm_to_vmem [thread:$0]  (!%p1843_p12), %s2068_s5, 256, %s361_s22, [#allocation3], %s1697_s17, %s1697_s17, %s1698_s24  }
  0x2f   : > { %p2091_p13 = scmp.ne.s32.totalorder %s2089_s20, 0 }
  0x30   : > { %p2092_p1 = scmp.eq.s32.totalorder (!%p2091_p13), %s1807_s29, 0 }
  0x31   : > { %404 = sbr.rel (%p2091_p13) target bundleno = 2618 (0xa3a), region = 72 }
  0x38   : > { %1673 = dma.done.wait (%p2092_p1), [#allocation3], 256   ;;  %p2093_p0 = pmov %p2092_p1 }
  0x39   : > { %p447_p5 = scmp.lt.s32.totalorder %s1807_s29, 1  ;;  %v1699_v0 = vmov 0.0   ;;  %vm1700_vm0 = vmmov 0   ;;  %s2094_s0 = sld [smem:[#allocation11_spill]]  ;;  %v1570_v1 = vld [vmem:[%s2064_s1] sm:$0xff]   ;;  %v1571_v2 = vld [vmem:[%s2064_s1 + $0x8] sm:$0xff]  }
  0x3a   : > { %1675 = vsyncadd (%p2093_p0), [#allocation3], 4294967040  ;;  %1418 = vmatprep.subr.bf16.mxu0 %v1699_v0  ;;  %1422 = vmatprep.mubr.msk.bf16.mxu0 %vm1700_vm0, %v1699_v0  ;;  %vm477_vm1 = vcmask 261120   ;;  %v1354_v5 = vld [vmem:[%s2065_s2] ss:$0 sm:$0xff]  ;;  %s1703_s20 = smov 80  }
  0x3b   : > { %s448_s27 = scalar_select %p447_p5, %s1807_s29, 1  ;;  %1426 = vmatprep.subr.bf16.mxu1 %v1699_v0  ;;  %1428 = vmatprep.mubr.msk.bf16.mxu1 %vm1700_vm0, %v1699_v0  ;;  %vm525_vm2 = vcmask 64512   ;;  %vm589_vm3 = vcmask 1043456   ;;  %vm976_vm4 = vcmask 130048   ;;  %vm978_vm5 = vcmask 195584  }
  0x3c   : > { %1419 = vmatpush3.bf16.msra.mxu0 %v1570_v1  ;;  %s1704_s22 = smov 88   ;;  %s1706_s15 = smov 112   ;;  %vm1186_vm6 = vcmask 523264  }
  0x3d   : > { %s1353_s14 = sshll.u32 %s448_s27, 3  ;;  %1420 = vmatprep.subr.bf16.mxu0 %v1699_v0  ;;  %s1701_s27 = smov 120  }
  0x3e   : > { %s1707_s21 = smov 104   ;;  %s1708_s17 = smov 56  }
  0x3f   : > { %s450_s23 = scalar_lea.vmem %s2094_s0, %s1353_s14  ;;  %s1702_s14 = smov 96  }
  0x40   : > { %v1886_v3 = vld [vmem:[%s450_s23] sm:$0xff]  ;;  %1421 = vmatpush3.bf16.msra.mxu0 %v1571_v2  ;;  %s1705_s23 = smov 72   ;;  %s1709_s24 = smov 64  }
  0x41   : > { %v453_v4 = vpack.c.bf16 %v1886_v3, %v1886_v3  ;;  %1432 = vmatprep.subr.bf16.mxu0 %v1699_v0  ;;  %s1710_s30 = smov 40   ;;  %s1711_s16 = smov 48  }
  0x42   : > { %p2095_p9 = scmp.ne.s32.totalorder %s2087_s18, 0 }
  0x43   : > { %1423 = vmatmul.mubr.msk.bf16.vlgmr.msra.gmra.mrb[0].mxu0 %vm477_vm1, %v453_v4 }
  0x44   : > { %1434 = vmatprep.mubr.msk.bf16.mxu0 %vm1700_vm0, %v1699_v0 }
 0x116   : > { %v515_v6 = vpop.f32.mrb[0].mxu0 }
 0x117   : > { %v516_v7 = vadd.f32 %v1354_v5, %v515_v6  ;;  %v1424_v8 = vpop.f32.mrb[1].mxu0 }
 0x118   : > { %v518_v9 = vpop.f32.mrb[2].mxu0 }
 0x119   : > { %v1898_v10 = vpack.c.bf16 %v516_v7, %v516_v7  ;;  %v1425_v11 = vpop.f32.mrb[3].mxu0 }
 0x11b   : > { %633 = vrot.lane.b32.xlu1 %v1898_v10, %s1701_s27  ;;  %523 = vrot.lane.b32.xlu0 %v1898_v10, %s1702_s14  ;;  %s1712_s27 = smov 8  }
 0x11f   : > { %745 = vrot.lane.b32.xlu1 %v1898_v10, %s1703_s20  ;;  %635 = vrot.lane.b32.xlu0 %v1898_v10, %s1704_s22  ;;  %s444_s22 = sand.u32 1, %s1686_s26  }
 0x123   : > { %855 = vrot.lane.b32.xlu1 %v1898_v10, %s1705_s23  ;;  %743 = vrot.lane.b32.xlu0 %v1898_v10, %s1706_s15  ;;  %s1713_s15 = smov 16   ;;  %s1352_s23 = sshll.u32 %s444_s22, 3 }
 0x127   : > { %853 = vrot.lane.b32.xlu0 %v1898_v10, %s1707_s21  ;;  %s1714_s21 = smov 24  }
 0x18d   : > { %v524_v12 = vpop.permute.xlu0 %523  ;;  %v634_v15 = vpop.permute.xlu1 %633 }
 0x18e   : > { %v530_v13 = vsel %vm525_vm2, %v524_v12, 0 }
 0x18f   : > { %1427 = vmatpush3.bf16.xpose.msra.mxu1 %v530_v13 }
 0x190   : > { %1438 = vmatprep.subr.bf16.mxu1 %v1699_v0 }
 0x191   : > { %v636_v14 = vpop.permute.xlu0 %635  ;;  %v746_v17 = vpop.permute.xlu1 %745 }
 0x192   : > { %v641_v16 = vsel %vm525_vm2, %v636_v14, 0  ;;  %v751_v18 = vsel %vm525_vm2, %v746_v17, 0 }
 0x195   : > { %v856_v19 = vpop.permute.xlu1 %855  ;;  %v744_v20 = vpop.permute.xlu0 %743 }
 0x196   : > { %1429 = vmatmul.mubr.msk.bf16.vlgmr.msra.gmra.mrb[0].mxu1 %vm525_vm2, %v1898_v10  ;;  %v861_v21 = vsel %vm525_vm2, %v856_v19, 0 }
 0x197   : > { %1439 = vmatpush3.bf16.xpose.msra.mxu1 %v641_v16  ;;  %1440 = vmatprep.mubr.msk.bf16.mxu1 %vm1700_vm0, %v1699_v0 }
 0x198   : > { %1450 = vmatprep.subr.bf16.mxu1 %v1699_v0 }
 0x199   : > { %v854_v22 = vpop.permute.xlu0 %853 }
 0x19e   : > { %1441 = vmatmul.mubr.msk.bf16.vlgmr.msra.gmra.mrb[4].mxu1 %vm525_vm2, %v634_v15 }
 0x19f   : > { %1451 = vmatpush3.bf16.xpose.msra.mxu1 %v751_v18  ;;  %1452 = vmatprep.mubr.msk.bf16.mxu1 %vm1700_vm0, %v1699_v0 }
 0x1a0   : > { %1462 = vmatprep.subr.bf16.mxu1 %v1699_v0 }
 0x1a6   : > { %1453 = vmatmul.mubr.msk.bf16.vlgmr.msra.gmra.mrb[8].mxu1 %vm525_vm2, %v744_v20 }
 0x1a7   : > { %1463 = vmatpush3.bf16.xpose.msra.mxu1 %v861_v21  ;;  %1464 = vmatprep.mubr.msk.bf16.mxu1 %vm1700_vm0, %v1699_v0 }
 0x1a8   : > { %1474 = vmatprep.subr.bf16.mxu1 %v1699_v0 }
 0x1ae   : > { %1465 = vmatmul.mubr.msk.bf16.vlgmr.msra.gmra.mrb[12].mxu1 %vm525_vm2, %v854_v22 }
 0x1af   : > { %1478 = vmatprep.mubr.msk.bf16.mxu1 %vm1700_vm0, %v1699_v0 }
 0x269   : > { %v566_v23 = vpop.f32.mrb[0].mxu1 }
 0x26a   : > { %v1430_v24 = vpop.f32.mrb[1].mxu1  ;;  %v572_v25 = vsel %vm525_vm2, %v566_v23, -inf }
 0x26b   : > { %573 = vmax.xlane.f32.xlu1 %v572_v25  ;;  %v569_v26 = vpop.f32.mrb[2].mxu1 }
 0x26c   : > { %v1431_v27 = vpop.f32.mrb[3].mxu1 }
 0x271   : > { %v677_v28 = vpop.f32.mrb[4].mxu1 }
 0x272   : > { %v1442_v29 = vpop.f32.mrb[5].mxu1  ;;  %v683_v30 = vsel %vm525_vm2, %v677_v28, -inf }
 0x273   : > { %684 = vmax.xlane.f32.xlu0 %v683_v30  ;;  %v680_v31 = vpop.f32.mrb[6].mxu1 }
 0x274   : > { %v1443_v32 = vpop.f32.mrb[7].mxu1 }
 0x279   : > { %v787_v33 = vpop.f32.mrb[8].mxu1 }
 0x27a   : > { %v1454_v34 = vpop.f32.mrb[9].mxu1  ;;  %v793_v35 = vsel %vm525_vm2, %v787_v33, -inf }
 0x27b   : > { %794 = vmax.xlane.f32.xlu0 %v793_v35  ;;  %v790_v36 = vpop.f32.mrb[10].mxu1  ;;  %v1573_v34 = vld [vmem:[%s2066_s3 + $0x8] sm:$0xff]  }
 0x27c   : > { %v1455_v37 = vpop.f32.mrb[11].mxu1 }
 0x281   : > { %v897_v38 = vpop.f32.mrb[12].mxu1 }
 0x282   : > { %v1466_v39 = vpop.f32.mrb[13].mxu1  ;;  %v903_v40 = vsel %vm525_vm2, %v897_v38, -inf }
 0x283   : > { %904 = vmax.xlane.f32.xlu1 %v903_v40  ;;  %v900_v41 = vpop.f32.mrb[14].mxu1 }
 0x284   : > { %v1467_v42 = vpop.f32.mrb[15].mxu1 }
 0x2f8   : > { %v574_v43 = vpop.xlane.xlu1 %573 }
 0x2f9   : > { %v575_v44 = vsub.f32 %v566_v23, %v574_v43 }
 0x2fb   : > { %v576_v45 = vmul.f32 1.442695, %v575_v44 }
 0x2fd   : > { %1580 = vpow2.f32 %v576_v45 }
 0x300   : > { %v685_v46 = vpop.xlane.xlu0 %684 }
 0x301   : > { %v686_v47 = vsub.f32 %v677_v28, %v685_v46 }
 0x303   : > { %v687_v48 = vmul.f32 1.442695, %v686_v47 }
 0x305   : > { %1582 = vpow2.f32 %v687_v48 }
 0x307   : > { %v1581_v49 = vpop.eup %1580 }
 0x308   : > { %v795_v50 = vpop.xlane.xlu0 %794  ;;  %v578_v51 = vsel %vm525_vm2, %v1581_v49, 0.0 }
 0x309   : > { %v796_v52 = vsub.f32 %v787_v33, %v795_v50  ;;  %579 = vadd.xlane.f32.xlu0 %v578_v51  ;;  %v1572_v33 = vld [vmem:[%s2066_s3] sm:$0xff]  }
 0x30a   : > { %1475 = vmatpush3.bf16.msra.mxu1 %v1572_v33  ;;  %v1366_v50 = vld [vmem:[%s2067_s4] ss:$0 sm:$0xff] }
 0x30b   : > { %v797_v53 = vmul.f32 1.442695, %v796_v52  ;;  %1476 = vmatprep.subr.bf16.mxu1 %v1699_v0 }
 0x30d   : > { %1584 = vpow2.f32 %v797_v53 }
 0x30e   : > { %1477 = vmatpush3.bf16.msra.mxu1 %v1573_v34 }
 0x30f   : > { %v1583_v54 = vpop.eup %1582  ;;  %1490 = vmatprep.subr.bf16.mxu1 %v1699_v0 }
 0x310   : > { %v689_v55 = vsel %vm525_vm2, %v1583_v54, 0.0  ;;  %v905_v58 = vpop.xlane.xlu1 %904 }
 0x311   : > { %690 = vadd.xlane.f32.xlu1 %v689_v55  ;;  %v906_v59 = vsub.f32 %v897_v38, %v905_v58 }
 0x313   : > { %v907_v60 = vmul.f32 1.442695, %v906_v59 }
 0x315   : > { %1586 = vpow2.f32 %v907_v60 }
 0x317   : > { %v1585_v56 = vpop.eup %1584 }
 0x318   : > { %v799_v57 = vsel %vm525_vm2, %v1585_v56, 0.0 }
 0x319   : > { %800 = vadd.xlane.f32.xlu0 %v799_v57 }
 0x31f   : > { %v1587_v61 = vpop.eup %1586 }
 0x320   : > { %v909_v62 = vsel %vm525_vm2, %v1587_v61, 0.0 }
 0x322   : > { %695 = vrot.lane.b32.xlu1 %v1898_v10, %s1708_s17 }
 0x32f   : > { %584 = vrot.lane.b32.xlu0 %v1898_v10, %s1709_s24 }
 0x333   : > { %915 = vrot.lane.b32.xlu0 %v1898_v10, %s1710_s30  ;;  %s1385_s30 = sshll.u32 %s1807_s29, 7  ;;  %s1715_s29 = smov [#allocation5]  }
 0x334   : > { %s2020_s0 = scalar_lea.hbm %s2076_s13, %s1385_s30 }
 0x346   : > { %910 = vadd.xlane.f32.xlu1 %v909_v62 }
 0x357   : > { %805 = vrot.lane.b32.xlu1 %v1898_v10, %s1711_s16  ;;  %s446_s16 = scalar_lea.vmem [#allocation5], %s1352_s23  ;;  %s1632_s23 = sshll.u32 %s1715_s29, 4  ;;  %s1633_s23 = int_to_ptr.vmem [resolvable:$false] %s1632_s23 }
 0x358   : > { %s1634_s17 = scalar_lea.vmem %s1633_s23, 256 }
 0x396   : > { %v580_v63 = vpop.xlane.xlu0 %579 }
 0x397   : > { %1588 = vrcp.f32 %v580_v63  ;;  %v1574_v63 = vld [vmem:[#allocation2] sm:$0xff]  }
 0x39e   : > { %v691_v1 = vpop.xlane.xlu1 %690 }
 0x39f   : > { %1590 = vrcp.f32 %v691_v1  ;;  %v1575_v1 = vld [vmem:[#allocation2 + $0x8] sm:$0xff]  }
 0x3a1   : > { %v1589_v2 = vpop.eup %1588 }
 0x3a2   : > { %v582_v5 = vmul.f32 %v1589_v2, %v1581_v49  ;;  %v696_v8 = vpop.permute.xlu1 %695  ;;  %v1577_v2 = vld [vmem:[%s2070_s7 + $0x8] sm:$0xff]  }
 0x3a3   : > { %v701_v12 = vsel %vm589_vm3, %v696_v8, 0  ;;  %v1370_v8 = vld [vmem:[%s2072_s9] ss:$0 sm:$0xff] }
 0x3a4   : > { %v583_v9 = vpack.c.bf16 %v582_v5, %v582_v5 }
 0x3a6   : > { %v801_v4 = vpop.xlane.xlu0 %800 }
 0x3a7   : > { %1592 = vrcp.f32 %v801_v4 }
 0x3a9   : > { %v1591_v11 = vpop.eup %1590 }
 0x3aa   : > { %v585_v6 = vpop.permute.xlu0 %584  ;;  %v693_v10 = vmul.f32 %v1591_v11, %v1583_v54  ;;  %v1371_v11 = vld [vmem:[%s2073_s10] ss:$0 sm:$0xff] }
 0x3ab   : > { %v591_v7 = vsel %vm589_vm3, %v585_v6, 0 }
 0x3ac   : > { %1433 = vmatpush3.bf16.msra.mxu0 %v591_v7  ;;  %v694_v13 = vpack.c.bf16 %v693_v10, %v693_v10 }
 0x3ad   : > { %1444 = vmatprep.subr.bf16.mxu0 %v1699_v0 }
 0x3ae   : > { %v916_v19 = vpop.permute.xlu0 %915 }
 0x3af   : > { %1435 = vmatmul.mubr.msk.bf16.vlgmr.msra.gmra.mrb[4].mxu0 %vm525_vm2, %v583_v9  ;;  %v921_v21 = vsel %vm589_vm3, %v916_v19, 0 }
 0x3b0   : > { %1445 = vmatpush3.bf16.msra.mxu0 %v701_v12  ;;  %1446 = vmatprep.mubr.msk.bf16.mxu0 %vm1700_vm0, %v1699_v0 }
 0x3b1   : > { %1456 = vmatprep.subr.bf16.mxu0 %v1699_v0  ;;  %v1593_v14 = vpop.eup %1592 }
 0x3b2   : > { %v803_v16 = vmul.f32 %v1593_v14, %v1585_v56  ;;  %v1578_v14 = vld [vmem:[%s2070_s7 + $0x10] sm:$0xff]  }
 0x3b4   : > { %v804_v20 = vpack.c.bf16 %v803_v16, %v803_v16  ;;  %v1372_v16 = vld [vmem:[%s2069_s6] ss:$0 sm:$0xff] }
 0x3b7   : > { %1447 = vmatmul.mubr.msk.bf16.vlgmr.msra.gmra.mrb[8].mxu0 %vm525_vm2, %v694_v13 }
 0x3b8   : > { %1458 = vmatprep.mubr.msk.bf16.mxu0 %vm1700_vm0, %v1699_v0 }
 0x3d3   : > { %v911_v15 = vpop.xlane.xlu1 %910 }
 0x3d4   : > { %1594 = vrcp.f32 %v911_v15  ;;  %v1579_v15 = vld [vmem:[%s2070_s7 + $0x18] sm:$0xff]  }
 0x3d7   : > { %v806_v17 = vpop.permute.xlu1 %805 }
 0x3d8   : > { %v811_v18 = vsel %vm589_vm3, %v806_v17, 0 }
 0x3d9   : > { %1457 = vmatpush3.bf16.msra.mxu0 %v811_v18 }
 0x3da   : > { %1468 = vmatprep.subr.bf16.mxu0 %v1699_v0 }
 0x3dc   : > { %1459 = vmatmul.mubr.msk.bf16.vlgmr.msra.gmra.mrb[12].mxu0 %vm525_vm2, %v804_v20 }
 0x3dd   : > { %1469 = vmatpush3.bf16.msra.mxu0 %v921_v21  ;;  %1470 = vmatprep.mubr.msk.bf16.mxu0 %vm1700_vm0, %v1699_v0 }
 0x3de   : > { %v1595_v22 = vpop.eup %1594  ;;  %1482 = vmatprep.subr.bf16.mxu0 %v1699_v0 }
 0x3df   : > { %v913_v23 = vmul.f32 %v1595_v22, %v1587_v61 }
 0x3e1   : > { %v914_v24 = vpack.c.bf16 %v913_v23, %v913_v23 }
 0x3e4   : > { %1471 = vmatmul.mubr.msk.bf16.vlgmr.msra.gmra.mrb[16].mxu0 %vm525_vm2, %v914_v24 }
 0x3e5   : > { %1486 = vmatprep.mubr.msk.bf16.mxu0 %vm1700_vm0, %v1699_v0  ;;  %1483 = vmatpush3.bf16.msra.mxu0 %v1574_v63 }
 0x3e6   : > { %1484 = vmatprep.subr.bf16.mxu0 %v1699_v0 }
 0x3e9   : > { %1485 = vmatpush3.bf16.msra.mxu0 %v1575_v1 }
 0x482   : > { %v627_v25 = vpop.f32.mrb[4].mxu0 }
 0x483   : > { %v1436_v26 = vpop.f32.mrb[5].mxu0 }
 0x484   : > { %v630_v27 = vpop.f32.mrb[6].mxu0 }
 0x485   : > { %v1437_v28 = vpop.f32.mrb[7].mxu0 }
 0x48a   : > { %v737_v29 = vpop.f32.mrb[8].mxu0 }
 0x48b   : > { %964 = vrot.lane.b32.xlu1 %v737_v29, %s1712_s27  ;;  %v1448_v30 = vpop.f32.mrb[9].mxu0  ;;  %s1275_s27 = sshll.u32 %s446_s16, 4  ;;  %s2022_s27 = int_to_ptr.vmem [resolvable:$true] %s1275_s27 }
 0x48c   : > { %v740_v31 = vpop.f32.mrb[10].mxu0  ;;  %p1635_p2 = scmp.lt.s32.totalorder %s2022_s27, %s1633_s23 }
 0x48d   : > { %v1449_v32 = vpop.f32.mrb[11].mxu0 }
 0x4af   : > { %v847_v35 = vpop.f32.mrb[12].mxu0 }
 0x4b0   : > { %968 = vrot.lane.b32.xlu0 %v847_v35, %s1713_s15  ;;  %v1460_v36 = vpop.f32.mrb[13].mxu0  ;;  %s1262_s15 = scalar_lea.sflag [#allocation4], %s444_s22 }
 0x4b1   : > { %v850_v37 = vpop.f32.mrb[14].mxu0 }
 0x4b2   : > { %v1461_v38 = vpop.f32.mrb[15].mxu0 }
 0x4b7   : > { %v957_v39 = vpop.f32.mrb[16].mxu0 }
 0x4b8   : > { %972 = vrot.lane.b32.xlu1 %v957_v39, %s1714_s21  ;;  %v1472_v40 = vpop.f32.mrb[17].mxu0  ;;  %s1628_s21 = scalar_lea.vmem %s2022_s27, 128 }
 0x4b9   : > { %v960_v41 = vpop.f32.mrb[18].mxu0  ;;  %v1382_v40 = vld [vmem:[%s2074_s11] ss:$0 sm:$0xff]  ;;  %p1629_p6 = scmp.ne.s32.totalorder %s2022_s27, %s1628_s21  ;;  %p1636_p3 = scmp.lt.s32.totalorder %s1634_s17, %s1628_s21 }
 0x4ba   : > { %v1473_v42 = vpop.f32.mrb[19].mxu0 }
 0x4bb   : > { %v1383_v42 = vld [vmem:[%s2075_s12] ss:$0 sm:$0xff]  ;;  %p1630_p10 = pnand %p1629_p6, %p2095_p9  ;;  %p1637_p4 = por %p1636_p3, %p1635_p2 }
 0x4bd   : > { %p1631_p12 = pneg %p1630_p10 }
 0x4bf   : > { %p1638_p7 = pnand %p1637_p4, %p1631_p12 }
 0x4fd   : > { %v965_v43 = vpop.permute.xlu1 %964 }
 0x4fe   : > { %v975_v45 = vsel %vm525_vm2, %v627_v25, %v965_v43 }
 0x522   : > { %v969_v44 = vpop.permute.xlu0 %968 }
 0x523   : > { %v977_v46 = vsel %vm976_vm4, %v975_v45, %v969_v44 }
 0x52a   : > { %v973_v47 = vpop.permute.xlu1 %972 }
 0x52b   : > { %v979_v48 = vsel %vm978_vm5, %v977_v46, %v973_v47 }
 0x52c   : > { %v980_v49 = vpack.c.bf16 %v979_v48, %v979_v48 }
 0x52e   : > { %1479 = vmatmul.mubr.msk.bf16.vlgmr.msra.gmra.mrb[16].mxu1 %vm477_vm1, %v980_v49 }
 0x52f   : > { %1498 = vmatprep.mubr.msk.bf16.mxu1 %vm1700_vm0, %v1699_v0 }
 0x601   : > { %v1041_v51 = vpop.f32.mrb[16].mxu1 }
 0x602   : > { %v1042_v52 = vadd.f32 %v1366_v50, %v1041_v51  ;;  %v1480_v53 = vpop.f32.mrb[17].mxu1 }
 0x603   : > { %v1044_v54 = vpop.f32.mrb[18].mxu1 }
 0x604   : > { %v1481_v55 = vpop.f32.mrb[19].mxu1  ;;  %v1047_v56 = vadd.f32 %v1042_v52, %v1886_v3  ;;  %v1576_v3 = vld [vmem:[%s2070_s7] sm:$0xff]  }
 0x605   : > { %1491 = vmatpush3.bf16.msra.mxu1 %v1576_v3 }
 0x606   : > { %v1048_v57 = vsel %vm477_vm1, %v1047_v56, 0.0  ;;  %1492 = vmatprep.subr.bf16.mxu1 %v1699_v0 }
 0x607   : > { %1049 = vadd.xlane.f32.xlu0 %v1048_v57 }
 0x609   : > { %1493 = vmatpush3.bf16.msra.mxu1 %v1577_v2 }
 0x60a   : > { %1494 = vmatprep.subr.bf16.mxu1 %v1699_v0 }
 0x60d   : > { %1495 = vmatpush3.bf16.msra.mxu1 %v1578_v14 }
 0x60e   : > { %1496 = vmatprep.subr.bf16.mxu1 %v1699_v0  ;;  %v1376_v0 = vld [vmem:[%s2071_s8] ss:$0 sm:$0xff] }
 0x611   : > { %1497 = vmatpush3.bf16.msra.mxu1 %v1579_v15 }
 0x694   : > { %v1050_v58 = vpop.xlane.xlu0 %1049 }
 0x695   : > { %v1052_v59 = vmul.f32 0.03125, %v1050_v58 }
 0x697   : > { %v1053_v60 = vsub.f32 %v1047_v56, %v1052_v59 }
 0x699   : > { %v1054_v61 = vmul.f32 %v1053_v60, %v1053_v60 }
 0x69b   : > { %v1055_v62 = vsel %vm477_vm1, %v1054_v61, 0.0 }
 0x69c   : > { %1056 = vadd.xlane.f32.xlu1 %v1055_v62 }
 0x729   : > { %v1057_v4 = vpop.xlane.xlu1 %1056 }
 0x72a   : > { %v1058_v5 = vmul.f32 0.03125, %v1057_v4 }
 0x72c   : > { %v1059_v6 = vadd.f32 1e-05, %v1058_v5 }
 0x72e   : > { %1596 = vrsqrt.f32 %v1059_v6 }
 0x738   : > { %v1597_v7 = vpop.eup %1596 }
 0x739   : > { %v1061_v9 = vmul.f32 %v1597_v7, %v1053_v60 }
 0x73b   : > { %v1069_v12 = vmul.f32 %v1370_v8, %v1061_v9 }
 0x73d   : > { %v1077_v10 = vadd.f32 %v1371_v11, %v1069_v12 }
 0x73f   : > { %v1078_v13 = vpack.c.bf16 %v1077_v10, %v1077_v10 }
 0x741   : > { %1487 = vmatmul.mubr.msk.bf16.vlgmr.msra.gmra.mrb[20].mxu0 %vm477_vm1, %v1078_v13 }
 0x814   : > { %v1139_v17 = vpop.f32.mrb[20].mxu0 }
 0x815   : > { %v1140_v18 = vadd.f32 %v1372_v16, %v1139_v17  ;;  %v1488_v19 = vpop.f32.mrb[21].mxu0 }
 0x816   : > { %v1142_v20 = vpop.f32.mrb[22].mxu0 }
 0x817   : > { %v1145_v21 = vmax.f32 %v1140_v18, 0.0  ;;  %v1489_v22 = vpop.f32.mrb[23].mxu0 }
 0x819   : > { %v1146_v23 = vpack.c.bf16 %v1145_v21, %v1145_v21 }
 0x81b   : > { %1499 = vmatmul.mubr.msk.bf16.vlgmr.msra.gmra.mrb[20].mxu1 %vm1186_vm6, %v1146_v23 }
 0x8ee   : > { %v1224_v24 = vpop.f32.mrb[20].mxu1 }
 0x8ef   : > { %v1225_v25 = vadd.f32 %v1376_v0, %v1224_v24  ;;  %v1500_v26 = vpop.f32.mrb[21].mxu1 }
 0x8f0   : > { %v1227_v27 = vpop.f32.mrb[22].mxu1 }
 0x8f1   : > { %v1501_v28 = vpop.f32.mrb[23].mxu1  ;;  %v1230_v29 = vadd.f32 %v1225_v25, %v1077_v10 }
 0x8f3   : > { %v1231_v30 = vsel %vm477_vm1, %v1230_v29, 0.0 }
 0x8f4   : > { %1232 = vadd.xlane.f32.xlu0 %v1231_v30 }
 0x981   : > { %v1233_v31 = vpop.xlane.xlu0 %1232 }
 0x982   : > { %v1234_v32 = vmul.f32 0.03125, %v1233_v31 }
 0x984   : > { %v1235_v33 = vsub.f32 %v1230_v29, %v1234_v32 }
 0x986   : > { %v1236_v34 = vmul.f32 %v1235_v33, %v1235_v33 }
 0x988   : > { %v1237_v35 = vsel %vm477_vm1, %v1236_v34, 0.0 }
 0x989   : > { %1238 = vadd.xlane.f32.xlu0 %v1237_v35 }
 0xa16   : > { %v1239_v36 = vpop.xlane.xlu0 %1238 }
 0xa17   : > { %v1240_v37 = vmul.f32 0.03125, %v1239_v36 }
 0xa19   : > { %v1241_v38 = vadd.f32 1e-05, %v1240_v37 }
 0xa1b   : > { %1598 = vrsqrt.f32 %v1241_v38 }
 0xa25   : > { %v1599_v39 = vpop.eup %1598 }
 0xa26   : > { %v1243_v41 = vmul.f32 %v1599_v39, %v1235_v33 }
 0xa28   : > { %v1251_v43 = vmul.f32 %v1382_v40, %v1243_v41 }
 0xa2a   : > { %v1259_v44 = vadd.f32 %v1383_v42, %v1251_v43 }
 0xa2c   : > { %1260 = vst.msk [vmem:[%s446_s16] sm:$0xff] %vm477_vm1, %v1259_v44 }
 0xa2d   : > { %1641 = shalt.err (!%p1638_p7)
}
 0xa2e   : > { %s1642_s22 = scalar_lea.hbm %s2020_s0, 128  ;;  %s1646_s16 = scalar_lea.hbm %s2076_s13, 256 }
 0xa2f   : > { %p1643_p8 = scmp.ne.s32.totalorder %s2020_s0, %s1642_s22  ;;  %p1647_p1 = scmp.lt.u32.totalorder %s2020_s0, %s2076_s13 }
 0xa30   : > { %p1648_p0 = scmp.lt.u32.totalorder %s1646_s16, %s1642_s22  ;;  %p1650_p6 = scmp.lt.u32.totalorder %s1642_s22, %s2020_s0 }
 0xa31   : > { %p1644_p11 = pnand %p1643_p8, %p2095_p9 }
 0xa32   : > { %p1649_p5 = por %p1648_p0, %p1647_p1 }
 0xa33   : > { %p1645_p13 = pneg %p1644_p11 }
 0xa34   : > { %p1651_p10 = por %p1650_p6, %p1649_p5 }
 0xa36   : > { %p1652_p12 = pnand %p1651_p10, %p1645_p13 }
 0xa38   : > { %1655 = shalt.err (!%p1652_p12)
}
 0xa39   : > { %1506 = dma.vmem_to_hbm [thread:$0]  (%p2095_p9), %s2022_s27, 128, %s2020_s0, %s1262_s15  }
 0xa3a PF: > { %p1518_p2 = scmp.ge.s32.totalorder %s1694_s28, 2  ;;  %s1287_s21 = sand.u32 1, %s1682_s25  }
 0xa3b   : > { %p2096_p3 = scmp.ne.s32.totalorder %s2088_s19, 0  ;;  %s1288_s29 = scalar_lea.sflag [#allocation4], %s1287_s21 }
 0xa3d   : > { %p1513_p4 = pnand %p1518_p2, %p2096_p3 }
 0xa3f   : > { %1677 = dma.done.wait (!%p1513_p4), %s1288_s29, 128  }
 0xa40   : > { %1679 = vsyncadd (!%p1513_p4), %s1288_s29, 4294967168  ;;  %s2097_s28 = sld [smem:[#allocation9_spill]]  ;;  %s2098_s23 = sld [smem:[#allocation8_spill]] }
 0xa41   : > { %s2099_s27 = sld [smem:[#allocation10_spill]]  ;;  %s2100_s25 = smov %s1686_s26 }
 0xa46   : > { %p24_p7 = scmp.ge.s32.totalorder %s2097_s28, 4   ;;  %s2101_s26 = smov %s2098_s23 }
 0xa48   :  { %26 = sbr.rel (!%p24_p7) target bundleno = 6 (0x6), region = 112 }
 0xa4f   :  { %1293 = vsyncpa [#allocation3], 1 }
 0xa50   :  { %1295 = vsyncpa [#allocation3 + $0x1], 1 }
 0xa51   :  { %1296 = vsyncpa [#allocation4], 1 }
 0xa52   :  { %1298 = vsyncpa [#allocation4 + $0x1], 1 }

</bundles_post_ra>
